<compile_context>
chip_gen: v5e
topology: v5e:2x2
jax: 0.10.0
libtpu: 0.0.40
codegen_flags: <defaults>
</compile_context>

<pallas_src>
import functools

import jax
import jax.numpy as jnp
import numpy as np
from jax.experimental import pallas as pl
from jax.experimental.pallas import tpu as pltpu


# ----------------------- fused fc1 + LSTM + fc2 kernel ----------------------
def _fused_decode_kernel(
    x_ref,        # (B, F)          image feature vectors
    wseq_ref,     # ((T-1)*B, E)    word embeddings fed at steps 1..T-1 (flat)
    w1_ref,       # (F, H)          fc1 weight (transposed)
    b1_ref,       # (1, H)          fc1 bias
    wih_x_ref,    # (H, 4H)         input->gates weights (image-feature part)
    wih_w_ref,    # (E, 4H)         input->gates weights (word-embedding part)
    whh_ref,      # (H, 4H)         hidden->gates weights
    bg_ref,       # (1, 4H)         b_ih + b_hh
    w2_ref,       # (H, V)          fc2 weight (transposed)
    b2_ref,       # (1, V)          fc2 bias
    out_ref,      # (T, B, V)       [one-hot | log-softmax steps 1..T-1]
    *,
    hidden,
    n_steps,      # = T - 1
    batch,
    start_word_id,
):
    H = hidden
    B = batch
    V = out_ref.shape[-1]

    # ---- fc1 (fused) ----
    x_h = (
        jnp.dot(x_ref[...], w1_ref[...], preferred_element_type=jnp.float32)
        + b1_ref[...]
    )  # (B, H)

    # ---- hoisted loop-invariant gate contributions ----
    gates_x = (
        jnp.dot(x_h, wih_x_ref[...], preferred_element_type=jnp.float32)
        + bg_ref[...]
    )  # (B, 4H), constant across all steps
    gates_w = jnp.dot(
        wseq_ref[...], wih_w_ref[...], preferred_element_type=jnp.float32
    )  # ((T-1)*B, 4H), all steps in one matmul

    whh = whh_ref[...]   # (H, 4H)
    w2 = w2_ref[...]     # (H, V)
    b2 = b2_ref[...]     # (1, V)

    # ---- row 0: start-symbol one-hot ----
    lane = jax.lax.broadcasted_iota(jnp.int32, (B, V), 1)
    out_ref[0] = jnp.where(lane == start_word_id, 1.0, 0.0).astype(out_ref.dtype)

    # lane mask selecting the cell-candidate ("g") gate block for tanh
    gidx = jax.lax.broadcasted_iota(jnp.int32, (B, 4 * H), 1)
    g_mask = (gidx >= 2 * H) & (gidx < 3 * H)

    h = jnp.zeros((B, H), jnp.float32)
    c = jnp.zeros((B, H), jnp.float32)

    # ---- recurrence, fully unrolled (n_steps is a small compile-time const) ----
    for t in range(n_steps):
        gates = (
            gates_x
            + gates_w[t * B:(t + 1) * B]
            + jnp.dot(h, whh, preferred_element_type=jnp.float32)
        )  # (B, 4H)

        # one sigmoid + one tanh over the full lane-dense vreg, then slice
        act = jnp.where(g_mask, jnp.tanh(gates), jax.nn.sigmoid(gates))
        i_g = act[:, 0 * H:1 * H]
        f_g = act[:, 1 * H:2 * H]
        g_g = act[:, 2 * H:3 * H]
        o_g = act[:, 3 * H:4 * H]

        c = f_g * c + i_g * g_g
        h = o_g * jnp.tanh(c)

        # fc2 + log-softmax (max-stabilized)
        logits = jnp.dot(h, w2, preferred_element_type=jnp.float32) + b2  # (B, V)
        m = jnp.max(logits, axis=-1, keepdims=True)
        lse = jnp.log(jnp.sum(jnp.exp(logits - m), axis=-1, keepdims=True)) + m
        out_ref[t + 1] = logits - lse


def fused_decode(X, w_seq_flat, params, max_sentence_len, start_word_id):
    """X: (B,F); w_seq_flat: ((T-1)*B, E) -> (T, B, V)."""
    B, F = X.shape
    H = params["w1_t"].shape[1]
    E = params["wih_w"].shape[0]
    V = params["w2_t"].shape[1]
    T = max_sentence_len
    n_steps = T - 1

    kernel = functools.partial(
        _fused_decode_kernel,
        hidden=H, n_steps=n_steps, batch=B, start_word_id=start_word_id,
    )
    return pl.pallas_call(
        kernel,
        out_shape=jax.ShapeDtypeStruct((T, B, V), jnp.float32),
        in_specs=[
            pl.BlockSpec((B, F), lambda: (0, 0)),
            pl.BlockSpec((n_steps * B, E), lambda: (0, 0)),
            pl.BlockSpec((F, H), lambda: (0, 0)),
            pl.BlockSpec((1, H), lambda: (0, 0)),
            pl.BlockSpec((H, 4 * H), lambda: (0, 0)),
            pl.BlockSpec((E, 4 * H), lambda: (0, 0)),
            pl.BlockSpec((H, 4 * H), lambda: (0, 0)),
            pl.BlockSpec((1, 4 * H), lambda: (0, 0)),
            pl.BlockSpec((H, V), lambda: (0, 0)),
            pl.BlockSpec((1, V), lambda: (0, 0)),
        ],
        out_specs=pl.BlockSpec((T, B, V), lambda: (0, 0, 0)),
    )(
        X, w_seq_flat,
        params["w1_t"], params["b1"],
        params["wih_x"], params["wih_w"], params["whh"], params["b_gates"],
        params["w2_t"], params["b2"],
    )


# ------------------------------ full forward --------------------------------
def forward_train(params, X, label, max_sentence_len, start_word_id):
    """Mirror of LSTM_2_Layer.forward_train.

    X:     (B, F) image feature vectors
    label: (T, B) int32 target word ids (teacher forcing)
    returns (B, T, V) — row 0 of each batch is the start-word one-hot, rows
    1..T-1 are log-softmax outputs of fc2.
    """
    B = X.shape[0]
    T = max_sentence_len
    E = params["emb_table"].shape[1]

    # ids_to_embed glue: word fed at step idx is start-embed for idx=1,
    # emb(label[idx-1]) for idx >= 2.
    start_embed = jnp.broadcast_to(params["start_embed"][None, None, :], (1, B, E))
    label_embeds = params["emb_table"][label]                              # (T, B, E)
    w_seq = jnp.concatenate([start_embed, label_embeds[1:T - 1]], axis=0)  # (T-1,B,E)
    w_seq_flat = w_seq.reshape((T - 1) * B, E)

    out = fused_decode(X, w_seq_flat, params, T, start_word_id)  # (T, B, V)
    return jnp.transpose(out, (1, 0, 2))                         # (B, T, V)


# ------------------------------ reference ----------------------------------
def forward_train_ref(params, X, label, max_sentence_len, start_word_id):
    B = X.shape[0]
    T = max_sentence_len
    H = params["whh"].shape[0]
    V = params["w2_t"].shape[1]

    x_h = X @ params["w1_t"] + params["b1"]
    h = jnp.zeros((B, H), jnp.float32)
    c = jnp.zeros((B, H), jnp.float32)
    word = jnp.broadcast_to(
        params["start_embed"][None, :], (B, params["emb_table"].shape[1]))

    outs = [jnp.zeros((B, V), jnp.float32).at[:, start_word_id].set(1.0)]
    for idx in range(1, T):
        gates = (word @ params["wih_w"] + x_h @ params["wih_x"]
                 + h @ params["whh"] + params["b_gates"])
        i_g = jax.nn.sigmoid(gates[:, 0 * H:1 * H])
        f_g = jax.nn.sigmoid(gates[:, 1 * H:2 * H])
        g_g = jnp.tanh(gates[:, 2 * H:3 * H])
        o_g = jax.nn.sigmoid(gates[:, 3 * H:4 * H])
        c = f_g * c + i_g * g_g
        h = o_g * jnp.tanh(c)
        logits = h @ params["w2_t"] + params["b2"]
        outs.append(jax.nn.log_softmax(logits, axis=-1))
        word = params["emb_table"][label[idx]]
    return jnp.stack(outs, axis=1)


# --------------------------------- main -------------------------------------
if __name__ == "__main__":
    # Small, module-consistent shapes.
    B = 2            # batch
    F = 64           # image_features_size
    H = 32           # lstm_hidden_size
    E = 16           # word_embedding_size
    V = 128          # vocab_size (= len(words2ids))
    T = 8            # max_sentence_len
    start_word_id = 0

    key = jax.random.PRNGKey(0)
    ks = jax.random.split(key, 10)

    def init(k, shape, scale=0.1):
        return jax.random.normal(k, shape, jnp.float32) * scale

    params = {
        # fc1: Linear(F -> H); stored transposed for (B,F)@(F,H)
        "w1_t": init(ks[0], (F, H)),
        "b1": init(ks[1], (1, H)),
        # LSTMCell(H+E -> H): W_ih is (4H, H+E) in torch; split + transpose
        "wih_x": init(ks[2], (H, 4 * H)),
        "wih_w": init(ks[3], (E, 4 * H)),
        "whh": init(ks[4], (H, 4 * H)),
        "b_gates": init(ks[5], (1, 4 * H)),   # b_ih + b_hh combined
        # fc2: Linear(H -> V), transposed
        "w2_t": init(ks[6], (H, V)),
        "b2": init(ks[7], (1, V)),
        # word embedding table + start-symbol embedding
        "emb_table": init(ks[8], (V, E), scale=0.5),
    }
    params["start_embed"] = params["emb_table"][start_word_id]

    X = jax.random.normal(ks[9], (B, F), jnp.float32)
    label = jax.random.randint(jax.random.PRNGKey(1), (T, B), 0, V, jnp.int32)

    out = forward_train(params, X, label, T, start_word_id)
    out = jax.block_until_ready(out)

    ref = forward_train_ref(params, X, label, T, start_word_id)
    np.testing.assert_allclose(np.asarray(out), np.asarray(ref), rtol=2e-5, atol=2e-5)
    assert out.shape == (B, T, V)

    print("KERNEL_OK")
</pallas_src>

<mosaic_0001>
module attributes {stable_mosaic.version = 11 : i64} {
  func.func @_fused_decode_kernel(%arg0: memref<2x64xf32, #tpu.memory_space<vmem>>, %arg1: memref<14x16xf32, #tpu.memory_space<vmem>>, %arg2: memref<64x32xf32, #tpu.memory_space<vmem>>, %arg3: memref<1x32xf32, #tpu.memory_space<vmem>>, %arg4: memref<32x128xf32, #tpu.memory_space<vmem>>, %arg5: memref<16x128xf32, #tpu.memory_space<vmem>>, %arg6: memref<32x128xf32, #tpu.memory_space<vmem>>, %arg7: memref<1x128xf32, #tpu.memory_space<vmem>>, %arg8: memref<32x128xf32, #tpu.memory_space<vmem>>, %arg9: memref<1x128xf32, #tpu.memory_space<vmem>>, %arg10: memref<8x2x128xf32, #tpu.memory_space<vmem>>) attributes {dimension_semantics = [], scalar_prefetch = 0 : i64, scratch_operands = 0 : i64, tpu.core_type = #tpu.core_type<tc>} {
    %c0 = arith.constant 0 : index
    %c0_0 = arith.constant 0 : index
    %0 = vector.load %arg0[%c0, %c0_0] : memref<2x64xf32, #tpu.memory_space<vmem>>, vector<2x64xf32>
    %c0_1 = arith.constant 0 : index
    %c0_2 = arith.constant 0 : index
    %1 = vector.load %arg2[%c0_1, %c0_2] : memref<64x32xf32, #tpu.memory_space<vmem>>, vector<64x32xf32>
    %cst = arith.constant dense<0.000000e+00> : vector<2x32xf32>
    %2 = tpu.matmul %0, %1, %cst {dimension_numbers = #tpu.dot_dimension_numbers<[1], [0], [0], [1], [0, 0, 1, 1], [], []>} : vector<2x64xf32>, vector<64x32xf32>, vector<2x32xf32> -> vector<2x32xf32>
    %c0_3 = arith.constant 0 : index
    %c0_4 = arith.constant 0 : index
    %3 = vector.load %arg3[%c0_3, %c0_4] : memref<1x32xf32, #tpu.memory_space<vmem>>, vector<1x32xf32>
    %4 = vector.broadcast %3 : vector<1x32xf32> to vector<2x32xf32>
    %5 = arith.addf %2, %4 : vector<2x32xf32>
    %c0_5 = arith.constant 0 : index
    %c0_6 = arith.constant 0 : index
    %6 = vector.load %arg4[%c0_5, %c0_6] : memref<32x128xf32, #tpu.memory_space<vmem>>, vector<32x128xf32>
    %cst_7 = arith.constant dense<0.000000e+00> : vector<2x128xf32>
    %7 = tpu.matmul %5, %6, %cst_7 {dimension_numbers = #tpu.dot_dimension_numbers<[1], [0], [0], [1], [0, 0, 1, 1], [], []>} : vector<2x32xf32>, vector<32x128xf32>, vector<2x128xf32> -> vector<2x128xf32>
    %c0_8 = arith.constant 0 : index
    %c0_9 = arith.constant 0 : index
    %8 = vector.load %arg7[%c0_8, %c0_9] : memref<1x128xf32, #tpu.memory_space<vmem>>, vector<1x128xf32>
    %9 = vector.broadcast %8 : vector<1x128xf32> to vector<2x128xf32>
    %10 = arith.addf %7, %9 : vector<2x128xf32>
    %c0_10 = arith.constant 0 : index
    %c0_11 = arith.constant 0 : index
    %11 = vector.load %arg1[%c0_10, %c0_11] : memref<14x16xf32, #tpu.memory_space<vmem>>, vector<14x16xf32>
    %c0_12 = arith.constant 0 : index
    %c0_13 = arith.constant 0 : index
    %12 = vector.load %arg5[%c0_12, %c0_13] : memref<16x128xf32, #tpu.memory_space<vmem>>, vector<16x128xf32>
    %cst_14 = arith.constant dense<0.000000e+00> : vector<14x128xf32>
    %13 = tpu.matmul %11, %12, %cst_14 {dimension_numbers = #tpu.dot_dimension_numbers<[1], [0], [0], [1], [0, 0, 1, 1], [], []>} : vector<14x16xf32>, vector<16x128xf32>, vector<14x128xf32> -> vector<14x128xf32>
    %c0_15 = arith.constant 0 : index
    %c0_16 = arith.constant 0 : index
    %14 = vector.load %arg6[%c0_15, %c0_16] : memref<32x128xf32, #tpu.memory_space<vmem>>, vector<32x128xf32>
    %c0_17 = arith.constant 0 : index
    %c0_18 = arith.constant 0 : index
    %15 = vector.load %arg8[%c0_17, %c0_18] : memref<32x128xf32, #tpu.memory_space<vmem>>, vector<32x128xf32>
    %c0_19 = arith.constant 0 : index
    %c0_20 = arith.constant 0 : index
    %16 = vector.load %arg9[%c0_19, %c0_20] : memref<1x128xf32, #tpu.memory_space<vmem>>, vector<1x128xf32>
    %17 = tpu.iota {dimensions = array<i32: 1>} : vector<2x128xi32>
    %c0_i32 = arith.constant 0 : i32
    %18 = vector.broadcast %c0_i32 : i32 to vector<2x128xi32>
    %19 = arith.cmpi eq, %17, %18 : vector<2x128xi32>
    %cst_21 = arith.constant 1.000000e+00 : f32
    %cst_22 = arith.constant 0.000000e+00 : f32
    %20 = vector.broadcast %cst_21 : f32 to vector<2x128xf32>
    %21 = vector.broadcast %cst_22 : f32 to vector<2x128xf32>
    %22 = arith.select %19, %20, %21 : vector<2x128xi1>, vector<2x128xf32>
    %c0_23 = arith.constant 0 : index
    %c0_24 = arith.constant 0 : index
    %c0_25 = arith.constant 0 : index
    %23 = vector.load %arg10[%c0_23, %c0_24, %c0_25] : memref<8x2x128xf32, #tpu.memory_space<vmem>>, vector<1x2x128xf32>
    %24 = vector.shape_cast %23 : vector<1x2x128xf32> to vector<2x128xf32>
    %25 = vector.shape_cast %22 : vector<2x128xf32> to vector<1x2x128xf32>
    tpu.vector_store %arg10[%c0_23, %c0_24, %c0_25], %25 {strides = array<i32>} : memref<8x2x128xf32, #tpu.memory_space<vmem>>, vector<1x2x128xf32>,
    %26 = tpu.iota {dimensions = array<i32: 1>} : vector<2x128xi32>
    %c64_i32 = arith.constant 64 : i32
    %27 = vector.broadcast %c64_i32 : i32 to vector<2x128xi32>
    %28 = arith.cmpi sge, %26, %27 : vector<2x128xi32>
    %c96_i32 = arith.constant 96 : i32
    %29 = vector.broadcast %c96_i32 : i32 to vector<2x128xi32>
    %30 = arith.cmpi slt, %26, %29 : vector<2x128xi32>
    %31 = arith.andi %28, %30 : vector<2x128xi1>
    %cst_26 = arith.constant 0.000000e+00 : f32
    %32 = vector.broadcast %cst_26 : f32 to vector<2x32xf32>
    %cst_27 = arith.constant 0.000000e+00 : f32
    %33 = vector.broadcast %cst_27 : f32 to vector<2x32xf32>
    %34 = vector.extract_strided_slice %13 {offsets = [0, 0], sizes = [2, 128], strides = [1, 1]} : vector<14x128xf32> to vector<2x128xf32>
    %35 = arith.addf %10, %34 : vector<2x128xf32>
    %cst_28 = arith.constant dense<0.000000e+00> : vector<2x128xf32>
    %36 = tpu.matmul %32, %14, %cst_28 {dimension_numbers = #tpu.dot_dimension_numbers<[1], [0], [0], [1], [0, 0, 1, 1], [], []>} : vector<2x32xf32>, vector<32x128xf32>, vector<2x128xf32> -> vector<2x128xf32>
    %37 = arith.addf %35, %36 : vector<2x128xf32>
    %38 = math.tanh %37 : vector<2x128xf32>
    %39 = arith.negf %37 : vector<2x128xf32>
    %40 = math.exp %39 : vector<2x128xf32>
    %cst_29 = arith.constant 1.000000e+00 : f32
    %41 = vector.broadcast %cst_29 : f32 to vector<2x128xf32>
    %42 = arith.addf %41, %40 : vector<2x128xf32>
    %43 = arith.divf %41, %42 : vector<2x128xf32>
    %44 = arith.select %31, %38, %43 : vector<2x128xi1>, vector<2x128xf32>
    %45 = vector.extract_strided_slice %44 {offsets = [0, 0], sizes = [2, 32], strides = [1, 1]} : vector<2x128xf32> to vector<2x32xf32>
    %46 = vector.extract_strided_slice %44 {offsets = [0, 32], sizes = [2, 32], strides = [1, 1]} : vector<2x128xf32> to vector<2x32xf32>
    %47 = vector.extract_strided_slice %44 {offsets = [0, 64], sizes = [2, 32], strides = [1, 1]} : vector<2x128xf32> to vector<2x32xf32>
    %48 = vector.extract_strided_slice %44 {offsets = [0, 96], sizes = [2, 32], strides = [1, 1]} : vector<2x128xf32> to vector<2x32xf32>
    %49 = arith.mulf %46, %33 : vector<2x32xf32>
    %50 = arith.mulf %45, %47 : vector<2x32xf32>
    %51 = arith.addf %49, %50 : vector<2x32xf32>
    %52 = math.tanh %51 : vector<2x32xf32>
    %53 = arith.mulf %48, %52 : vector<2x32xf32>
    %cst_30 = arith.constant dense<0.000000e+00> : vector<2x128xf32>
    %54 = tpu.matmul %53, %15, %cst_30 {dimension_numbers = #tpu.dot_dimension_numbers<[1], [0], [0], [1], [0, 0, 1, 1], [], []>} : vector<2x32xf32>, vector<32x128xf32>, vector<2x128xf32> -> vector<2x128xf32>
    %55 = vector.broadcast %16 : vector<1x128xf32> to vector<2x128xf32>
    %56 = arith.addf %54, %55 : vector<2x128xf32>
    %cst_31 = arith.constant dense<0xFF800000> : vector<2xf32>
    %57 = vector.multi_reduction <maximumf>, %56, %cst_31 [1] : vector<2x128xf32> to vector<2xf32>
    %58 = vector.shape_cast %57 : vector<2xf32> to vector<2x1xf32>
    %59 = vector.broadcast %58 : vector<2x1xf32> to vector<2x128xf32>
    %60 = arith.subf %56, %59 : vector<2x128xf32>
    %61 = math.exp %60 : vector<2x128xf32>
    %cst_32 = arith.constant dense<0.000000e+00> : vector<2xf32>
    %62 = vector.multi_reduction <add>, %61, %cst_32 [1] : vector<2x128xf32> to vector<2xf32>
    %63 = vector.shape_cast %62 : vector<2xf32> to vector<2x1xf32>
    %64 = math.log %63 : vector<2x1xf32>
    %65 = arith.addf %64, %58 : vector<2x1xf32>
    %66 = vector.broadcast %65 : vector<2x1xf32> to vector<2x128xf32>
    %67 = arith.subf %56, %66 : vector<2x128xf32>
    %c1 = arith.constant 1 : index
    %c0_33 = arith.constant 0 : index
    %c0_34 = arith.constant 0 : index
    %68 = vector.load %arg10[%c1, %c0_33, %c0_34] : memref<8x2x128xf32, #tpu.memory_space<vmem>>, vector<1x2x128xf32>
    %69 = vector.shape_cast %68 : vector<1x2x128xf32> to vector<2x128xf32>
    %70 = vector.shape_cast %67 : vector<2x128xf32> to vector<1x2x128xf32>
    tpu.vector_store %arg10[%c1, %c0_33, %c0_34], %70 {strides = array<i32>} : memref<8x2x128xf32, #tpu.memory_space<vmem>>, vector<1x2x128xf32>,
    %71 = vector.extract_strided_slice %13 {offsets = [2, 0], sizes = [2, 128], strides = [1, 1]} : vector<14x128xf32> to vector<2x128xf32>
    %72 = arith.addf %10, %71 : vector<2x128xf32>
    %cst_35 = arith.constant dense<0.000000e+00> : vector<2x128xf32>
    %73 = tpu.matmul %53, %14, %cst_35 {dimension_numbers = #tpu.dot_dimension_numbers<[1], [0], [0], [1], [0, 0, 1, 1], [], []>} : vector<2x32xf32>, vector<32x128xf32>, vector<2x128xf32> -> vector<2x128xf32>
    %74 = arith.addf %72, %73 : vector<2x128xf32>
    %75 = math.tanh %74 : vector<2x128xf32>
    %76 = arith.negf %74 : vector<2x128xf32>
    %77 = math.exp %76 : vector<2x128xf32>
    %cst_36 = arith.constant 1.000000e+00 : f32
    %78 = vector.broadcast %cst_36 : f32 to vector<2x128xf32>
    %79 = arith.addf %78, %77 : vector<2x128xf32>
    %80 = arith.divf %78, %79 : vector<2x128xf32>
    %81 = arith.select %31, %75, %80 : vector<2x128xi1>, vector<2x128xf32>
    %82 = vector.extract_strided_slice %81 {offsets = [0, 0], sizes = [2, 32], strides = [1, 1]} : vector<2x128xf32> to vector<2x32xf32>
    %83 = vector.extract_strided_slice %81 {offsets = [0, 32], sizes = [2, 32], strides = [1, 1]} : vector<2x128xf32> to vector<2x32xf32>
    %84 = vector.extract_strided_slice %81 {offsets = [0, 64], sizes = [2, 32], strides = [1, 1]} : vector<2x128xf32> to vector<2x32xf32>
    %85 = vector.extract_strided_slice %81 {offsets = [0, 96], sizes = [2, 32], strides = [1, 1]} : vector<2x128xf32> to vector<2x32xf32>
    %86 = arith.mulf %83, %51 : vector<2x32xf32>
    %87 = arith.mulf %82, %84 : vector<2x32xf32>
    %88 = arith.addf %86, %87 : vector<2x32xf32>
    %89 = math.tanh %88 : vector<2x32xf32>
    %90 = arith.mulf %85, %89 : vector<2x32xf32>
    %cst_37 = arith.constant dense<0.000000e+00> : vector<2x128xf32>
    %91 = tpu.matmul %90, %15, %cst_37 {dimension_numbers = #tpu.dot_dimension_numbers<[1], [0], [0], [1], [0, 0, 1, 1], [], []>} : vector<2x32xf32>, vector<32x128xf32>, vector<2x128xf32> -> vector<2x128xf32>
    %92 = vector.broadcast %16 : vector<1x128xf32> to vector<2x128xf32>
    %93 = arith.addf %91, %92 : vector<2x128xf32>
    %cst_38 = arith.constant dense<0xFF800000> : vector<2xf32>
    %94 = vector.multi_reduction <maximumf>, %93, %cst_38 [1] : vector<2x128xf32> to vector<2xf32>
    %95 = vector.shape_cast %94 : vector<2xf32> to vector<2x1xf32>
    %96 = vector.broadcast %95 : vector<2x1xf32> to vector<2x128xf32>
    %97 = arith.subf %93, %96 : vector<2x128xf32>
    %98 = math.exp %97 : vector<2x128xf32>
    %cst_39 = arith.constant dense<0.000000e+00> : vector<2xf32>
    %99 = vector.multi_reduction <add>, %98, %cst_39 [1] : vector<2x128xf32> to vector<2xf32>
    %100 = vector.shape_cast %99 : vector<2xf32> to vector<2x1xf32>
    %101 = math.log %100 : vector<2x1xf32>
    %102 = arith.addf %101, %95 : vector<2x1xf32>
    %103 = vector.broadcast %102 : vector<2x1xf32> to vector<2x128xf32>
    %104 = arith.subf %93, %103 : vector<2x128xf32>
    %c2 = arith.constant 2 : index
    %c0_40 = arith.constant 0 : index
    %c0_41 = arith.constant 0 : index
    %105 = vector.load %arg10[%c2, %c0_40, %c0_41] : memref<8x2x128xf32, #tpu.memory_space<vmem>>, vector<1x2x128xf32>
    %106 = vector.shape_cast %105 : vector<1x2x128xf32> to vector<2x128xf32>
    %107 = vector.shape_cast %104 : vector<2x128xf32> to vector<1x2x128xf32>
    tpu.vector_store %arg10[%c2, %c0_40, %c0_41], %107 {strides = array<i32>} : memref<8x2x128xf32, #tpu.memory_space<vmem>>, vector<1x2x128xf32>,
    %108 = vector.extract_strided_slice %13 {offsets = [4, 0], sizes = [2, 128], strides = [1, 1]} : vector<14x128xf32> to vector<2x128xf32>
    %109 = arith.addf %10, %108 : vector<2x128xf32>
    %cst_42 = arith.constant dense<0.000000e+00> : vector<2x128xf32>
    %110 = tpu.matmul %90, %14, %cst_42 {dimension_numbers = #tpu.dot_dimension_numbers<[1], [0], [0], [1], [0, 0, 1, 1], [], []>} : vector<2x32xf32>, vector<32x128xf32>, vector<2x128xf32> -> vector<2x128xf32>
    %111 = arith.addf %109, %110 : vector<2x128xf32>
    %112 = math.tanh %111 : vector<2x128xf32>
    %113 = arith.negf %111 : vector<2x128xf32>
    %114 = math.exp %113 : vector<2x128xf32>
    %cst_43 = arith.constant 1.000000e+00 : f32
    %115 = vector.broadcast %cst_43 : f32 to vector<2x128xf32>
    %116 = arith.addf %115, %114 : vector<2x128xf32>
    %117 = arith.divf %115, %116 : vector<2x128xf32>
    %118 = arith.select %31, %112, %117 : vector<2x128xi1>, vector<2x128xf32>
    %119 = vector.extract_strided_slice %118 {offsets = [0, 0], sizes = [2, 32], strides = [1, 1]} : vector<2x128xf32> to vector<2x32xf32>
    %120 = vector.extract_strided_slice %118 {offsets = [0, 32], sizes = [2, 32], strides = [1, 1]} : vector<2x128xf32> to vector<2x32xf32>
    %121 = vector.extract_strided_slice %118 {offsets = [0, 64], sizes = [2, 32], strides = [1, 1]} : vector<2x128xf32> to vector<2x32xf32>
    %122 = vector.extract_strided_slice %118 {offsets = [0, 96], sizes = [2, 32], strides = [1, 1]} : vector<2x128xf32> to vector<2x32xf32>
    %123 = arith.mulf %120, %88 : vector<2x32xf32>
    %124 = arith.mulf %119, %121 : vector<2x32xf32>
    %125 = arith.addf %123, %124 : vector<2x32xf32>
    %126 = math.tanh %125 : vector<2x32xf32>
    %127 = arith.mulf %122, %126 : vector<2x32xf32>
    %cst_44 = arith.constant dense<0.000000e+00> : vector<2x128xf32>
    %128 = tpu.matmul %127, %15, %cst_44 {dimension_numbers = #tpu.dot_dimension_numbers<[1], [0], [0], [1], [0, 0, 1, 1], [], []>} : vector<2x32xf32>, vector<32x128xf32>, vector<2x128xf32> -> vector<2x128xf32>
    %129 = vector.broadcast %16 : vector<1x128xf32> to vector<2x128xf32>
    %130 = arith.addf %128, %129 : vector<2x128xf32>
    %cst_45 = arith.constant dense<0xFF800000> : vector<2xf32>
    %131 = vector.multi_reduction <maximumf>, %130, %cst_45 [1] : vector<2x128xf32> to vector<2xf32>
    %132 = vector.shape_cast %131 : vector<2xf32> to vector<2x1xf32>
    %133 = vector.broadcast %132 : vector<2x1xf32> to vector<2x128xf32>
    %134 = arith.subf %130, %133 : vector<2x128xf32>
    %135 = math.exp %134 : vector<2x128xf32>
    %cst_46 = arith.constant dense<0.000000e+00> : vector<2xf32>
    %136 = vector.multi_reduction <add>, %135, %cst_46 [1] : vector<2x128xf32> to vector<2xf32>
    %137 = vector.shape_cast %136 : vector<2xf32> to vector<2x1xf32>
    %138 = math.log %137 : vector<2x1xf32>
    %139 = arith.addf %138, %132 : vector<2x1xf32>
    %140 = vector.broadcast %139 : vector<2x1xf32> to vector<2x128xf32>
    %141 = arith.subf %130, %140 : vector<2x128xf32>
    %c3 = arith.constant 3 : index
    %c0_47 = arith.constant 0 : index
    %c0_48 = arith.constant 0 : index
    %142 = vector.load %arg10[%c3, %c0_47, %c0_48] : memref<8x2x128xf32, #tpu.memory_space<vmem>>, vector<1x2x128xf32>
    %143 = vector.shape_cast %142 : vector<1x2x128xf32> to vector<2x128xf32>
    %144 = vector.shape_cast %141 : vector<2x128xf32> to vector<1x2x128xf32>
    tpu.vector_store %arg10[%c3, %c0_47, %c0_48], %144 {strides = array<i32>} : memref<8x2x128xf32, #tpu.memory_space<vmem>>, vector<1x2x128xf32>,
    %145 = vector.extract_strided_slice %13 {offsets = [6, 0], sizes = [2, 128], strides = [1, 1]} : vector<14x128xf32> to vector<2x128xf32>
    %146 = arith.addf %10, %145 : vector<2x128xf32>
    %cst_49 = arith.constant dense<0.000000e+00> : vector<2x128xf32>
    %147 = tpu.matmul %127, %14, %cst_49 {dimension_numbers = #tpu.dot_dimension_numbers<[1], [0], [0], [1], [0, 0, 1, 1], [], []>} : vector<2x32xf32>, vector<32x128xf32>, vector<2x128xf32> -> vector<2x128xf32>
    %148 = arith.addf %146, %147 : vector<2x128xf32>
    %149 = math.tanh %148 : vector<2x128xf32>
    %150 = arith.negf %148 : vector<2x128xf32>
    %151 = math.exp %150 : vector<2x128xf32>
    %cst_50 = arith.constant 1.000000e+00 : f32
    %152 = vector.broadcast %cst_50 : f32 to vector<2x128xf32>
    %153 = arith.addf %152, %151 : vector<2x128xf32>
    %154 = arith.divf %152, %153 : vector<2x128xf32>
    %155 = arith.select %31, %149, %154 : vector<2x128xi1>, vector<2x128xf32>
    %156 = vector.extract_strided_slice %155 {offsets = [0, 0], sizes = [2, 32], strides = [1, 1]} : vector<2x128xf32> to vector<2x32xf32>
    %157 = vector.extract_strided_slice %155 {offsets = [0, 32], sizes = [2, 32], strides = [1, 1]} : vector<2x128xf32> to vector<2x32xf32>
    %158 = vector.extract_strided_slice %155 {offsets = [0, 64], sizes = [2, 32], strides = [1, 1]} : vector<2x128xf32> to vector<2x32xf32>
    %159 = vector.extract_strided_slice %155 {offsets = [0, 96], sizes = [2, 32], strides = [1, 1]} : vector<2x128xf32> to vector<2x32xf32>
    %160 = arith.mulf %157, %125 : vector<2x32xf32>
    %161 = arith.mulf %156, %158 : vector<2x32xf32>
    %162 = arith.addf %160, %161 : vector<2x32xf32>
    %163 = math.tanh %162 : vector<2x32xf32>
    %164 = arith.mulf %159, %163 : vector<2x32xf32>
    %cst_51 = arith.constant dense<0.000000e+00> : vector<2x128xf32>
    %165 = tpu.matmul %164, %15, %cst_51 {dimension_numbers = #tpu.dot_dimension_numbers<[1], [0], [0], [1], [0, 0, 1, 1], [], []>} : vector<2x32xf32>, vector<32x128xf32>, vector<2x128xf32> -> vector<2x128xf32>
    %166 = vector.broadcast %16 : vector<1x128xf32> to vector<2x128xf32>
    %167 = arith.addf %165, %166 : vector<2x128xf32>
    %cst_52 = arith.constant dense<0xFF800000> : vector<2xf32>
    %168 = vector.multi_reduction <maximumf>, %167, %cst_52 [1] : vector<2x128xf32> to vector<2xf32>
    %169 = vector.shape_cast %168 : vector<2xf32> to vector<2x1xf32>
    %170 = vector.broadcast %169 : vector<2x1xf32> to vector<2x128xf32>
    %171 = arith.subf %167, %170 : vector<2x128xf32>
    %172 = math.exp %171 : vector<2x128xf32>
    %cst_53 = arith.constant dense<0.000000e+00> : vector<2xf32>
    %173 = vector.multi_reduction <add>, %172, %cst_53 [1] : vector<2x128xf32> to vector<2xf32>
    %174 = vector.shape_cast %173 : vector<2xf32> to vector<2x1xf32>
    %175 = math.log %174 : vector<2x1xf32>
    %176 = arith.addf %175, %169 : vector<2x1xf32>
    %177 = vector.broadcast %176 : vector<2x1xf32> to vector<2x128xf32>
    %178 = arith.subf %167, %177 : vector<2x128xf32>
    %c4 = arith.constant 4 : index
    %c0_54 = arith.constant 0 : index
    %c0_55 = arith.constant 0 : index
    %179 = vector.load %arg10[%c4, %c0_54, %c0_55] : memref<8x2x128xf32, #tpu.memory_space<vmem>>, vector<1x2x128xf32>
    %180 = vector.shape_cast %179 : vector<1x2x128xf32> to vector<2x128xf32>
    %181 = vector.shape_cast %178 : vector<2x128xf32> to vector<1x2x128xf32>
    tpu.vector_store %arg10[%c4, %c0_54, %c0_55], %181 {strides = array<i32>} : memref<8x2x128xf32, #tpu.memory_space<vmem>>, vector<1x2x128xf32>,
    %182 = vector.extract_strided_slice %13 {offsets = [8, 0], sizes = [2, 128], strides = [1, 1]} : vector<14x128xf32> to vector<2x128xf32>
    %183 = arith.addf %10, %182 : vector<2x128xf32>
    %cst_56 = arith.constant dense<0.000000e+00> : vector<2x128xf32>
    %184 = tpu.matmul %164, %14, %cst_56 {dimension_numbers = #tpu.dot_dimension_numbers<[1], [0], [0], [1], [0, 0, 1, 1], [], []>} : vector<2x32xf32>, vector<32x128xf32>, vector<2x128xf32> -> vector<2x128xf32>
    %185 = arith.addf %183, %184 : vector<2x128xf32>
    %186 = math.tanh %185 : vector<2x128xf32>
    %187 = arith.negf %185 : vector<2x128xf32>
    %188 = math.exp %187 : vector<2x128xf32>
    %cst_57 = arith.constant 1.000000e+00 : f32
    %189 = vector.broadcast %cst_57 : f32 to vector<2x128xf32>
    %190 = arith.addf %189, %188 : vector<2x128xf32>
    %191 = arith.divf %189, %190 : vector<2x128xf32>
    %192 = arith.select %31, %186, %191 : vector<2x128xi1>, vector<2x128xf32>
    %193 = vector.extract_strided_slice %192 {offsets = [0, 0], sizes = [2, 32], strides = [1, 1]} : vector<2x128xf32> to vector<2x32xf32>
    %194 = vector.extract_strided_slice %192 {offsets = [0, 32], sizes = [2, 32], strides = [1, 1]} : vector<2x128xf32> to vector<2x32xf32>
    %195 = vector.extract_strided_slice %192 {offsets = [0, 64], sizes = [2, 32], strides = [1, 1]} : vector<2x128xf32> to vector<2x32xf32>
    %196 = vector.extract_strided_slice %192 {offsets = [0, 96], sizes = [2, 32], strides = [1, 1]} : vector<2x128xf32> to vector<2x32xf32>
    %197 = arith.mulf %194, %162 : vector<2x32xf32>
    %198 = arith.mulf %193, %195 : vector<2x32xf32>
    %199 = arith.addf %197, %198 : vector<2x32xf32>
    %200 = math.tanh %199 : vector<2x32xf32>
    %201 = arith.mulf %196, %200 : vector<2x32xf32>
    %cst_58 = arith.constant dense<0.000000e+00> : vector<2x128xf32>
    %202 = tpu.matmul %201, %15, %cst_58 {dimension_numbers = #tpu.dot_dimension_numbers<[1], [0], [0], [1], [0, 0, 1, 1], [], []>} : vector<2x32xf32>, vector<32x128xf32>, vector<2x128xf32> -> vector<2x128xf32>
    %203 = vector.broadcast %16 : vector<1x128xf32> to vector<2x128xf32>
    %204 = arith.addf %202, %203 : vector<2x128xf32>
    %cst_59 = arith.constant dense<0xFF800000> : vector<2xf32>
    %205 = vector.multi_reduction <maximumf>, %204, %cst_59 [1] : vector<2x128xf32> to vector<2xf32>
    %206 = vector.shape_cast %205 : vector<2xf32> to vector<2x1xf32>
    %207 = vector.broadcast %206 : vector<2x1xf32> to vector<2x128xf32>
    %208 = arith.subf %204, %207 : vector<2x128xf32>
    %209 = math.exp %208 : vector<2x128xf32>
    %cst_60 = arith.constant dense<0.000000e+00> : vector<2xf32>
    %210 = vector.multi_reduction <add>, %209, %cst_60 [1] : vector<2x128xf32> to vector<2xf32>
    %211 = vector.shape_cast %210 : vector<2xf32> to vector<2x1xf32>
    %212 = math.log %211 : vector<2x1xf32>
    %213 = arith.addf %212, %206 : vector<2x1xf32>
    %214 = vector.broadcast %213 : vector<2x1xf32> to vector<2x128xf32>
    %215 = arith.subf %204, %214 : vector<2x128xf32>
    %c5 = arith.constant 5 : index
    %c0_61 = arith.constant 0 : index
    %c0_62 = arith.constant 0 : index
    %216 = vector.load %arg10[%c5, %c0_61, %c0_62] : memref<8x2x128xf32, #tpu.memory_space<vmem>>, vector<1x2x128xf32>
    %217 = vector.shape_cast %216 : vector<1x2x128xf32> to vector<2x128xf32>
    %218 = vector.shape_cast %215 : vector<2x128xf32> to vector<1x2x128xf32>
    tpu.vector_store %arg10[%c5, %c0_61, %c0_62], %218 {strides = array<i32>} : memref<8x2x128xf32, #tpu.memory_space<vmem>>, vector<1x2x128xf32>,
    %219 = vector.extract_strided_slice %13 {offsets = [10, 0], sizes = [2, 128], strides = [1, 1]} : vector<14x128xf32> to vector<2x128xf32>
    %220 = arith.addf %10, %219 : vector<2x128xf32>
    %cst_63 = arith.constant dense<0.000000e+00> : vector<2x128xf32>
    %221 = tpu.matmul %201, %14, %cst_63 {dimension_numbers = #tpu.dot_dimension_numbers<[1], [0], [0], [1], [0, 0, 1, 1], [], []>} : vector<2x32xf32>, vector<32x128xf32>, vector<2x128xf32> -> vector<2x128xf32>
    %222 = arith.addf %220, %221 : vector<2x128xf32>
    %223 = math.tanh %222 : vector<2x128xf32>
    %224 = arith.negf %222 : vector<2x128xf32>
    %225 = math.exp %224 : vector<2x128xf32>
    %cst_64 = arith.constant 1.000000e+00 : f32
    %226 = vector.broadcast %cst_64 : f32 to vector<2x128xf32>
    %227 = arith.addf %226, %225 : vector<2x128xf32>
    %228 = arith.divf %226, %227 : vector<2x128xf32>
    %229 = arith.select %31, %223, %228 : vector<2x128xi1>, vector<2x128xf32>
    %230 = vector.extract_strided_slice %229 {offsets = [0, 0], sizes = [2, 32], strides = [1, 1]} : vector<2x128xf32> to vector<2x32xf32>
    %231 = vector.extract_strided_slice %229 {offsets = [0, 32], sizes = [2, 32], strides = [1, 1]} : vector<2x128xf32> to vector<2x32xf32>
    %232 = vector.extract_strided_slice %229 {offsets = [0, 64], sizes = [2, 32], strides = [1, 1]} : vector<2x128xf32> to vector<2x32xf32>
    %233 = vector.extract_strided_slice %229 {offsets = [0, 96], sizes = [2, 32], strides = [1, 1]} : vector<2x128xf32> to vector<2x32xf32>
    %234 = arith.mulf %231, %199 : vector<2x32xf32>
    %235 = arith.mulf %230, %232 : vector<2x32xf32>
    %236 = arith.addf %234, %235 : vector<2x32xf32>
    %237 = math.tanh %236 : vector<2x32xf32>
    %238 = arith.mulf %233, %237 : vector<2x32xf32>
    %cst_65 = arith.constant dense<0.000000e+00> : vector<2x128xf32>
    %239 = tpu.matmul %238, %15, %cst_65 {dimension_numbers = #tpu.dot_dimension_numbers<[1], [0], [0], [1], [0, 0, 1, 1], [], []>} : vector<2x32xf32>, vector<32x128xf32>, vector<2x128xf32> -> vector<2x128xf32>
    %240 = vector.broadcast %16 : vector<1x128xf32> to vector<2x128xf32>
    %241 = arith.addf %239, %240 : vector<2x128xf32>
    %cst_66 = arith.constant dense<0xFF800000> : vector<2xf32>
    %242 = vector.multi_reduction <maximumf>, %241, %cst_66 [1] : vector<2x128xf32> to vector<2xf32>
    %243 = vector.shape_cast %242 : vector<2xf32> to vector<2x1xf32>
    %244 = vector.broadcast %243 : vector<2x1xf32> to vector<2x128xf32>
    %245 = arith.subf %241, %244 : vector<2x128xf32>
    %246 = math.exp %245 : vector<2x128xf32>
    %cst_67 = arith.constant dense<0.000000e+00> : vector<2xf32>
    %247 = vector.multi_reduction <add>, %246, %cst_67 [1] : vector<2x128xf32> to vector<2xf32>
    %248 = vector.shape_cast %247 : vector<2xf32> to vector<2x1xf32>
    %249 = math.log %248 : vector<2x1xf32>
    %250 = arith.addf %249, %243 : vector<2x1xf32>
    %251 = vector.broadcast %250 : vector<2x1xf32> to vector<2x128xf32>
    %252 = arith.subf %241, %251 : vector<2x128xf32>
    %c6 = arith.constant 6 : index
    %c0_68 = arith.constant 0 : index
    %c0_69 = arith.constant 0 : index
    %253 = vector.load %arg10[%c6, %c0_68, %c0_69] : memref<8x2x128xf32, #tpu.memory_space<vmem>>, vector<1x2x128xf32>
    %254 = vector.shape_cast %253 : vector<1x2x128xf32> to vector<2x128xf32>
    %255 = vector.shape_cast %252 : vector<2x128xf32> to vector<1x2x128xf32>
    tpu.vector_store %arg10[%c6, %c0_68, %c0_69], %255 {strides = array<i32>} : memref<8x2x128xf32, #tpu.memory_space<vmem>>, vector<1x2x128xf32>,
    %256 = vector.extract_strided_slice %13 {offsets = [12, 0], sizes = [2, 128], strides = [1, 1]} : vector<14x128xf32> to vector<2x128xf32>
    %257 = arith.addf %10, %256 : vector<2x128xf32>
    %cst_70 = arith.constant dense<0.000000e+00> : vector<2x128xf32>
    %258 = tpu.matmul %238, %14, %cst_70 {dimension_numbers = #tpu.dot_dimension_numbers<[1], [0], [0], [1], [0, 0, 1, 1], [], []>} : vector<2x32xf32>, vector<32x128xf32>, vector<2x128xf32> -> vector<2x128xf32>
    %259 = arith.addf %257, %258 : vector<2x128xf32>
    %260 = math.tanh %259 : vector<2x128xf32>
    %261 = arith.negf %259 : vector<2x128xf32>
    %262 = math.exp %261 : vector<2x128xf32>
    %cst_71 = arith.constant 1.000000e+00 : f32
    %263 = vector.broadcast %cst_71 : f32 to vector<2x128xf32>
    %264 = arith.addf %263, %262 : vector<2x128xf32>
    %265 = arith.divf %263, %264 : vector<2x128xf32>
    %266 = arith.select %31, %260, %265 : vector<2x128xi1>, vector<2x128xf32>
    %267 = vector.extract_strided_slice %266 {offsets = [0, 0], sizes = [2, 32], strides = [1, 1]} : vector<2x128xf32> to vector<2x32xf32>
    %268 = vector.extract_strided_slice %266 {offsets = [0, 32], sizes = [2, 32], strides = [1, 1]} : vector<2x128xf32> to vector<2x32xf32>
    %269 = vector.extract_strided_slice %266 {offsets = [0, 64], sizes = [2, 32], strides = [1, 1]} : vector<2x128xf32> to vector<2x32xf32>
    %270 = vector.extract_strided_slice %266 {offsets = [0, 96], sizes = [2, 32], strides = [1, 1]} : vector<2x128xf32> to vector<2x32xf32>
    %271 = arith.mulf %268, %236 : vector<2x32xf32>
    %272 = arith.mulf %267, %269 : vector<2x32xf32>
    %273 = arith.addf %271, %272 : vector<2x32xf32>
    %274 = math.tanh %273 : vector<2x32xf32>
    %275 = arith.mulf %270, %274 : vector<2x32xf32>
    %cst_72 = arith.constant dense<0.000000e+00> : vector<2x128xf32>
    %276 = tpu.matmul %275, %15, %cst_72 {dimension_numbers = #tpu.dot_dimension_numbers<[1], [0], [0], [1], [0, 0, 1, 1], [], []>} : vector<2x32xf32>, vector<32x128xf32>, vector<2x128xf32> -> vector<2x128xf32>
    %277 = vector.broadcast %16 : vector<1x128xf32> to vector<2x128xf32>
    %278 = arith.addf %276, %277 : vector<2x128xf32>
    %cst_73 = arith.constant dense<0xFF800000> : vector<2xf32>
    %279 = vector.multi_reduction <maximumf>, %278, %cst_73 [1] : vector<2x128xf32> to vector<2xf32>
    %280 = vector.shape_cast %279 : vector<2xf32> to vector<2x1xf32>
    %281 = vector.broadcast %280 : vector<2x1xf32> to vector<2x128xf32>
    %282 = arith.subf %278, %281 : vector<2x128xf32>
    %283 = math.exp %282 : vector<2x128xf32>
    %cst_74 = arith.constant dense<0.000000e+00> : vector<2xf32>
    %284 = vector.multi_reduction <add>, %283, %cst_74 [1] : vector<2x128xf32> to vector<2xf32>
    %285 = vector.shape_cast %284 : vector<2xf32> to vector<2x1xf32>
    %286 = math.log %285 : vector<2x1xf32>
    %287 = arith.addf %286, %280 : vector<2x1xf32>
    %288 = vector.broadcast %287 : vector<2x1xf32> to vector<2x128xf32>
    %289 = arith.subf %278, %288 : vector<2x128xf32>
    %c7 = arith.constant 7 : index
    %c0_75 = arith.constant 0 : index
    %c0_76 = arith.constant 0 : index
    %290 = vector.load %arg10[%c7, %c0_75, %c0_76] : memref<8x2x128xf32, #tpu.memory_space<vmem>>, vector<1x2x128xf32>
    %291 = vector.shape_cast %290 : vector<1x2x128xf32> to vector<2x128xf32>
    %292 = vector.shape_cast %289 : vector<2x128xf32> to vector<1x2x128xf32>
    tpu.vector_store %arg10[%c7, %c0_75, %c0_76], %292 {strides = array<i32>} : memref<8x2x128xf32, #tpu.memory_space<vmem>>, vector<1x2x128xf32>,
    return
  }
}

</mosaic_0001>

<bundles_post_ra>
// kernel: tpu_custom_call.1
= control target key start
LH: loop header
LB: loop body
LE: loop exit
PB: predicated region body
PF: predicated region fallthrough
CT: control target
= control target key end

     0   :  { %15 = vsyncpa [#allocation3], 0  ;;  %s1520_s0 = inlined_call_operand.hbm [shape: f32[2,64], index: 0, kind: input, shape index: {}]   ;;  %s1521_s1 = inlined_call_operand.hbm [shape: f32[14,16], index: 1, kind: input, shape index: {}]   ;;  %s1522_s2 = inlined_call_operand.vmem [shape: f32[64,32], index: 2, kind: input, shape index: {}]   ;;  %s1523_s3 = inlined_call_operand.vmem [shape: f32[1,32], index: 3, kind: input, shape index: {}]   ;;  %s1524_s4 = inlined_call_operand.vmem [shape: f32[32,128], index: 4, kind: input, shape index: {}]   ;;  %s1525_s5 = inlined_call_operand.hbm [shape: f32[16,128], index: 5, kind: input, shape index: {}]   ;;  %s1526_s6 = inlined_call_operand.vmem [shape: f32[32,128], index: 6, kind: input, shape index: {}]   ;;  %s1527_s7 = inlined_call_operand.vmem [shape: f32[1,128], index: 7, kind: input, shape index: {}]   ;;  %s1528_s8 = inlined_call_operand.vmem [shape: f32[32,128], index: 8, kind: input, shape index: {}]   ;;  %s1529_s9 = inlined_call_operand.vmem [shape: f32[1,128], index: 9, kind: input, shape index: {}]   ;;  %s1530_s10 = inlined_call_operand.hbm [shape: f32[8,2,128], index: 10, kind: output, shape index: {}]  }
   0x1   :  { %16 = vsyncpa [#allocation6], 0  ;;  %s33_s15 = sshll.u32 %s1521_s1, 4  ;;  %s34_s15 = int_to_ptr.hbm [resolvable:$true] %s33_s15 }
   0x2   :  { %17 = vsyncpa [#allocation4], 0  ;;  %s1163_s16 = smov [#allocation5]   ;;  %s23_s20 = sshll.u32 %s1520_s0, 4  ;;  %s24_s20 = int_to_ptr.hbm [resolvable:$true] %s23_s20 }
   0x3   :  { %s35_s17 = sshll.u32 %s1163_s16, 4  ;;  %s1164_s21 = smov 128   ;;  %s36_s17 = int_to_ptr.vmem [resolvable:$true] %s35_s17 }
   0x4   :  { %s1165_s22 = smov 8   ;;  %s1166_s23 = smov [#allocation2]  }
   0x5   :  { %41 = dma.hbm_to_vmem [thread:$0]  %s34_s15, 256, %s36_s17, [#allocation6], %s1164_s21, %s1164_s21, %s1165_s22  }
   0x6   :  { %s25_s24 = sshll.u32 %s1166_s23, 4  ;;  %s52_s27 = sshll.u32 %s1525_s5, 4  ;;  %s26_s24 = int_to_ptr.vmem [resolvable:$true] %s25_s24  ;;  %s53_s27 = int_to_ptr.hbm [resolvable:$true] %s52_s27 }
   0x7   :  { %28 = dma.hbm_to_vmem [thread:$0]  %s24_s20, 32, %s26_s24, [#allocation3]  }
   0x8   :  { %s1167_s1 = smov [#allocation7]  }
   0x9   :  { %s54_s28 = sshll.u32 %s1167_s1, 4  ;;  %s55_s28 = int_to_ptr.vmem [resolvable:$true] %s54_s28 }
   0xa   :  { %60 = dma.hbm_to_vmem [thread:$0]  %s53_s27, 256, %s55_s28, [#allocation6], %s1164_s21, %s1164_s21, %s1165_s22  }
   0xb   :  { %1157 = dma.done.wait [#allocation3], 32  }
   0xc   :  { %1158 = vsyncadd [#allocation3], 4294967264 }
   0xd   :  { %1159 = dma.done.wait [#allocation6], 512  }
   0xe   :  { %1160 = vsyncadd [#allocation6], 4294966784  ;;  %v89_v0 = vld [vmem:[%s1522_s2 + $0x38] sm:$0xff]  ;;  %v88_v1 = vld [vmem:[%s1522_s2 + $0x30] sm:$0xff]  ;;  %vm154_vm0 = vcmask 130048   ;;  %vm94_vm1 = vcmask 523264   ;;  %v193_v20 = vlaneseq }
   0xf   :  { %106 = vmatpush.msra.mxu0 %v89_v0  ;;  %v87_v2 = vld [vmem:[%s1522_s2 + $0x28] sm:$0xff]  ;;  %v86_v3 = vld [vmem:[%s1522_s2 + $0x20] sm:$0xff]  ;;  %v152_v5 = vld [vmem:[#allocation7] sm:$0xff]  ;;  %v1168_v21 = vmov 0.0   ;;  %vm126_vm3 = vcmask 261120   ;;  %s926_s28 = sshll.u32 %s1530_s10, 4  ;;  %s927_s28 = int_to_ptr.hbm [resolvable:$true] %s926_s28 }
  0x10   :  { %v153_v4 = vld [vmem:[#allocation7 + $0x8] sm:$0xff]  ;;  %v150_v6 = vld [vmem:[#allocation5] sm:$0xff]  ;;  %v1261_v9 = vld [vmem:[%s1526_s6 + $0x10] sm:$0xff]  ;;  %v194_v23 = vand.u32 127, %v193_v20  ;;  %s1172_s0 = smov 2  }
  0x11   :  { %107 = vmatpush.msra.mxu0 %v88_v1  ;;  %175 = vmatpush.msra.mxu2 %v153_v4  ;;  %v1252_v7 = vld [vmem:[%s1526_s6 + $0x18] sm:$0xff]  ;;  %v120_v10 = vld [vmem:[%s1524_s4 + $0x10] sm:$0xff]  ;;  %v1273_v12 = vld [vmem:[%s1526_s6 + $0x8] sm:$0xff] }
  0x12   :  { %v121_v8 = vld [vmem:[%s1524_s4 + $0x18] sm:$0xff]  ;;  %217 = vmatpush.msra.mxu3 %v1252_v7  ;;  %v84_v13 = vld [vmem:[%s1522_s2 + $0x10] sm:$0xff]  ;;  %v83_v14 = vld [vmem:[%s1522_s2 + $0x8] sm:$0xff]  ;;  %vm195_vm2 = vcmp.eq.s32.totalorder %v194_v23, 0  ;;  %vm198_vm4 = vcmp.ge.s32.totalorder %v194_v23, 64  ;;  %vm199_vm5 = vcmp.lt.s32.totalorder %v194_v23, 96 }
  0x13   :  { %108 = vmatpush.msra.mxu0 %v87_v2  ;;  %v85_v11 = vld [vmem:[%s1522_s2 + $0x18] sm:$0xff]  ;;  %176 = vmatpush.msra.mxu2 %v152_v5  ;;  %v82_v15 = vld [vmem:[%s1522_s2] sm:$0xff]  ;;  %v151_v16 = vld [vmem:[#allocation5 + $0x8] sm:$0x3f]  ;;  %v196_v24 = vsel %vm195_vm2, 1.0, %v1168_v21 }
  0x14   :  { %142 = vmatpush.msra.mxu1 %v121_v8  ;;  %942 = vmatmul.msk.f32.vlgmr.msra.gmra.mxu2 %vm154_vm0, %v150_v6  ;;  %v81_v17 = vld [vmem:[#allocation2] sm:$0x3]  ;;  %v119_v18 = vld [vmem:[%s1524_s4 + $0x8] sm:$0xff]  ;;  %197 = vst [vmem:[#allocation8] sm:$0x3] %v196_v24  ;;  %vm1334_vm7 = vmand %vm198_vm4, %vm199_vm5 }
  0x15   :  { %109 = vmatpush.msra.mxu0 %v86_v3  ;;  %218 = vmatpush.msra.mxu3 %v1261_v9  ;;  %v1296_v19 = vld [vmem:[%s1526_s6] sm:$0xff]  ;;  %v1349_v63 = vld [vmem:[%s1528_s8 + $0x18] sm:$0xff]  ;;  %v1354_v0 = vld [vmem:[%s1528_s8 + $0x10] sm:$0xff] }
  0x16   :  { %143 = vmatpush.msra.mxu1 %v120_v10  ;;  %v118_v22 = vld [vmem:[%s1524_s4] sm:$0xff]  ;;  %388 = vmatpush.msrb.mxu2 %v1349_v63  ;;  %v1361_v1 = vld [vmem:[%s1528_s8 + $0x8] sm:$0xff] }
  0x17   :  { %110 = vmatpush.msra.mxu0 %v85_v11  ;;  %219 = vmatpush.msra.mxu3 %v1273_v12  ;;  %v974_v25 = vld [vmem:[%s1523_s3] ss:$0 sm:$0xff]  ;;  %s1169_s3 = smov 64  }
  0x18   :  { %144 = vmatpush.msra.mxu1 %v119_v18  ;;  %v975_v28 = vld [vmem:[%s1527_s7] ss:$0 sm:$0xff]  ;;  %s1170_s7 = smov 32   ;;  %389 = vmatpush.msrb.mxu2 %v1354_v0 }
  0x19   :  { %111 = vmatpush.msra.mxu0 %v84_v13  ;;  %220 = vmatpush.msra.mxu3 %v1296_v19  ;;  %v1368_v2 = vld [vmem:[%s1528_s8] sm:$0xff] }
  0x1a   :  { %221 = vmatmul.f32.vlgmr.msra.gmra.mxu3 %v1168_v21  ;;  %145 = vmatpush.msra.mxu1 %v118_v22 }
  0x1b   :  { %112 = vmatpush.msra.mxu0 %v83_v14  ;;  %324 = vmatpush.msrb.mxu3 %v1252_v7 }
  0x1c   :  { %943 = vmatmul.msk.f32.gmra.mxu2 %vm154_vm0, %v151_v16  ;;  %284 = vmatpush.msrb.mxu1 %v1349_v63 }
  0x1d   :  { %113 = vmatpush.msra.mxu0 %v82_v15  ;;  %325 = vmatpush.msrb.mxu3 %v1261_v9 }
  0x1e   :  { %940 = vmatmul.msk.f32.vlgmr.msra.gmra.mxu0 %vm94_vm1, %v81_v17  ;;  %285 = vmatpush.msrb.mxu1 %v1354_v0 }
  0x1f   :  { %426 = vmatpush.msrb.mxu0 %v1252_v7  ;;  %326 = vmatpush.msrb.mxu3 %v1273_v12 }
  0x20   :  { %286 = vmatpush.msrb.mxu1 %v1361_v1  ;;  %390 = vmatpush.msrb.mxu2 %v1361_v1 }
  0x21   :  { %427 = vmatpush.msrb.mxu0 %v1261_v9  ;;  %327 = vmatpush.msrb.mxu3 %v1296_v19 }
  0x22   :  { %287 = vmatpush.msrb.mxu1 %v1368_v2  ;;  %391 = vmatpush.msrb.mxu2 %v1368_v2 }
  0x23   :  { %428 = vmatpush.msrb.mxu0 %v1273_v12  ;;  %528 = vmatpush.msra.mxu3 %v1252_v7 }
  0x24   :  { %592 = vmatpush.msra.mxu2 %v1349_v63 }
  0x25   :  { %429 = vmatpush.msrb.mxu0 %v1296_v19  ;;  %529 = vmatpush.msra.mxu3 %v1261_v9 }
  0x26   :  { %593 = vmatpush.msra.mxu2 %v1354_v0 }
  0x27   :  { %628 = vmatpush.msra.mxu0 %v1252_v7  ;;  %530 = vmatpush.msra.mxu3 %v1273_v12 }
  0x28   :  { %594 = vmatpush.msra.mxu2 %v1361_v1 }
  0x29   :  { %629 = vmatpush.msra.mxu0 %v1261_v9  ;;  %531 = vmatpush.msra.mxu3 %v1296_v19 }
  0x2a   :  { %595 = vmatpush.msra.mxu2 %v1368_v2 }
  0x2b   :  { %630 = vmatpush.msra.mxu0 %v1273_v12 }
  0x2d   :  { %631 = vmatpush.msra.mxu0 %v1296_v19 }
  0x97   :  { %v178_v29 = vpop.f32.mrf.mxu2 }
  0x98   :  { %v309_v30 = vrot.slane %v178_v29, 2  ;;  %v411_v31 = vrot.slane %v178_v29, 4  ;;  %v513_v32 = vrot.slane %v178_v29, 6 }
  0x9b   :  { %v115_v26 = vpop.f32.mrf.mxu0 }
  0x9c   :  { %v116_v27 = vadd.f32 %v974_v25, %v115_v26 }
  0x9d   :  { %v222_v35 = vpop.f32.mrf.mxu3 }
  0x9e   :  { %941 = vmatmul.msk.f32.vlgmr.msra.gmra.mxu1 %vm126_vm3, %v116_v27 }
  0x9f   :  { %490 = vmatpush.msra.mxu1 %v1349_v63 }
  0xa1   :  { %491 = vmatpush.msra.mxu1 %v1354_v0 }
  0xa3   :  { %492 = vmatpush.msra.mxu1 %v1361_v1 }
  0xa5   :  { %493 = vmatpush.msra.mxu1 %v1368_v2 }
 0x11b   :  { %v147_v33 = vpop.f32.mrf.mxu1 }
 0x11c   :  { %v1322_v34 = vadd.f32 %v975_v28, %v147_v33 }
 0x11e   :  { %v201_v36 = vadd.f32 %v178_v29, %v1322_v34  ;;  %v1326_v37 = vadd.f32 %v309_v30, %v1322_v34  ;;  %v1329_v38 = vadd.f32 %v411_v31, %v1322_v34  ;;  %v1332_v39 = vadd.f32 %v513_v32, %v1322_v34 }
 0x120   :  { %v225_v40 = vadd.f32 %v222_v35, %v201_v36 }
 0x122   :  { %v944_v41 = vmul.f32 -1.442695, %v225_v40 }
 0x124   :  { %977 = vpow2.f32 %v944_v41 }
 0x12a   :  { %v978_v42 = vpop.eup %977 }
 0x12b   :  { %v230_v43 = vadd.f32 1.0, %v978_v42 }
 0x12d   :  { %979 = vrcp.f32 %v230_v43  ;;  %v242_v47 = vand.u32 2147483648, %v230_v43  ;;  %v240_v49 = vand.u32 2147483647, %v230_v43  ;;  %vm236_vm8 = vweird.f32 %v230_v43 }
 0x12e   :  { %981 = vtanh.f32 %v225_v40 }
 0x12f   :  { %v243_v52 = vor.u32 1.1754944e-38, %v242_v47  ;;  %vm241_vm10 = vcmp.eq.f32.partialorder %v240_v49, 8.507059e+37 }
 0x133   :  { %v980_v44 = vpop.eup %979 }
 0x134   :  { %v232_v45 = vmul.f32 %v980_v44, %v230_v43  ;;  %vm237_vm6 = vweird.f32 %v980_v44  ;;  %v982_v54 = vpop.eup %981 }
 0x135   :  { %vm238_vm9 = vmor %vm236_vm8, %vm237_vm6 }
 0x136   :  { %v233_v46 = vsub.f32 1.0, %v232_v45 }
 0x138   :  { %v234_v48 = vmul.f32 %v980_v44, %v233_v46 }
 0x13a   :  { %v235_v51 = vadd.f32 %v980_v44, %v234_v48 }
 0x13c   :  { %v239_v53 = vsel %vm238_vm9, %v980_v44, %v235_v51 }
 0x13d   :  { %v244_v55 = vsel %vm241_vm10, %v243_v52, %v239_v53 }
 0x13e   :  { %v246_v56 = vsel %vm1334_vm7, %v982_v54, %v244_v55 }
 0x13f   :  { %249 = vrot.lane.b32.xlu0 %v246_v56, %s1169_s3  ;;  %v247_v59 = vmul.f32 0.0, %v246_v56 }
 0x1b1   :  { %v250_v57 = vpop.permute.xlu0 %249 }
 0x1b2   :  { %v252_v58 = vmul.f32 %v250_v57, %v246_v56 }
 0x1b4   :  { %254 = vrot.lane.b32.xlu0 %v252_v58, %s1170_s7 }
 0x226   :  { %v255_v60 = vpop.permute.xlu0 %254 }
 0x227   :  { %v1342_v61 = vadd.f32 %v255_v60, %v247_v59 }
 0x229   :  { %983 = vtanh.f32 %v1342_v61 }
 0x22f   :  { %v984_v62 = vpop.eup %983 }
 0x230   :  { %260 = vrot.lane.b32.xlu1 %v984_v62, %s1169_s3 }
 0x2a2   :  { %v261_v3 = vpop.permute.xlu1 %260 }
 0x2a3   :  { %v263_v4 = vmul.f32 %v261_v3, %v246_v56 }
 0x2a5   :  { %268 = vrot.lane.b32.xlu1 %v263_v4, %s1170_s7 }
 0x317   :  { %v269_v5 = vpop.permute.xlu1 %268 }
 0x318   :  { %945 = vmatmul.msk.f32.vlgmr.msrb.gmra.mxu1 %vm126_vm3, %v269_v5  ;;  %946 = vmatmul.msk.f32.vlgmr.msrb.gmra.mxu3 %vm126_vm3, %v269_v5 }
 0x319   :  { %731 = vmatpush.msrb.mxu3 %v1252_v7  ;;  %692 = vmatpush.msrb.mxu1 %v1349_v63 }
 0x31b   :  { %732 = vmatpush.msrb.mxu3 %v1261_v9  ;;  %693 = vmatpush.msrb.mxu1 %v1354_v0 }
 0x31d   :  { %733 = vmatpush.msrb.mxu3 %v1273_v12  ;;  %694 = vmatpush.msrb.mxu1 %v1361_v1 }
 0x31f   :  { %734 = vmatpush.msrb.mxu3 %v1296_v19  ;;  %695 = vmatpush.msrb.mxu1 %v1368_v2 }
 0x39b   :  { %v329_v6 = vpop.f32.mrf.mxu3 }
 0x39c   :  { %v332_v8 = vadd.f32 %v329_v6, %v1326_v37 }
 0x39e   :  { %v947_v10 = vmul.f32 -1.442695, %v332_v8 }
 0x3a0   :  { %985 = vpow2.f32 %v947_v10 }
 0x3a6   :  { %v986_v11 = vpop.eup %985 }
 0x3a7   :  { %v337_v13 = vadd.f32 1.0, %v986_v11 }
 0x3a9   :  { %987 = vrcp.f32 %v337_v13  ;;  %v349_v17 = vand.u32 2147483648, %v337_v13  ;;  %v347_v20 = vand.u32 2147483647, %v337_v13  ;;  %vm343_vm12 = vweird.f32 %v337_v13 }
 0x3aa   :  { %989 = vtanh.f32 %v332_v8 }
 0x3ab   :  { %v350_v22 = vor.u32 1.1754944e-38, %v349_v17  ;;  %vm348_vm14 = vcmp.eq.f32.partialorder %v347_v20, 8.507059e+37 }
 0x3af   :  { %v988_v14 = vpop.eup %987 }
 0x3b0   :  { %v339_v15 = vmul.f32 %v988_v14, %v337_v13  ;;  %vm344_vm11 = vweird.f32 %v988_v14  ;;  %v990_v24 = vpop.eup %989 }
 0x3b1   :  { %vm345_vm13 = vmor %vm343_vm12, %vm344_vm11 }
 0x3b2   :  { %v340_v16 = vsub.f32 1.0, %v339_v15 }
 0x3b4   :  { %v341_v18 = vmul.f32 %v988_v14, %v340_v16 }
 0x3b6   :  { %v342_v21 = vadd.f32 %v988_v14, %v341_v18 }
 0x3b8   :  { %v346_v23 = vsel %vm345_vm13, %v988_v14, %v342_v21 }
 0x3b9   :  { %v351_v25 = vsel %vm348_vm14, %v350_v22, %v346_v23 }
 0x3ba   :  { %v353_v26 = vsel %vm1334_vm7, %v990_v24, %v351_v25 }
 0x3bb   :  { %356 = vrot.lane.b32.xlu2 %v353_v26, %s1169_s3  ;;  %v354_v29 = vmul.f32 %v353_v26, %v1342_v61 }
 0x415   :  { %v357_v27 = vpop.permute.xlu2 %356 }
 0x416   :  { %v359_v28 = vmul.f32 %v357_v27, %v353_v26 }
 0x418   :  { %361 = vrot.lane.b32.xlu2 %v359_v28, %s1170_s7 }
 0x472   :  { %v362_v30 = vpop.permute.xlu2 %361 }
 0x473   :  { %v364_v31 = vadd.f32 %v362_v30, %v354_v29 }
 0x475   :  { %991 = vtanh.f32 %v364_v31 }
 0x47b   :  { %v992_v32 = vpop.eup %991 }
 0x47c   :  { %367 = vrot.lane.b32.xlu0 %v992_v32, %s1169_s3 }
 0x4ee   :  { %v368_v33 = vpop.permute.xlu0 %367 }
 0x4ef   :  { %v370_v35 = vmul.f32 %v368_v33, %v353_v26  ;;  %v1433_v26 = vpop.f32.mrf.mxu2 }
 0x4f0   :  { %v615_v27 = vadd.f32 %v1433_v26, %v1322_v34 }
 0x4f1   :  { %372 = vrot.lane.b32.xlu1 %v370_v35, %s1170_s7 }
 0x563   :  { %v373_v36 = vpop.permute.xlu1 %372 }
 0x564   :  { %948 = vmatmul.msk.f32.vlgmr.msrb.gmra.mxu2 %vm126_vm3, %v373_v36  ;;  %949 = vmatmul.msk.f32.vlgmr.msrb.gmra.mxu0 %vm126_vm3, %v373_v36 }
 0x565   :  { %833 = vmatpush.msrb.mxu0 %v1252_v7  ;;  %795 = vmatpush.msrb.mxu2 %v1349_v63 }
 0x567   :  { %834 = vmatpush.msrb.mxu0 %v1261_v9  ;;  %796 = vmatpush.msrb.mxu2 %v1354_v0 }
 0x569   :  { %835 = vmatpush.msrb.mxu0 %v1273_v12  ;;  %797 = vmatpush.msrb.mxu2 %v1361_v1 }
 0x56b   :  { %836 = vmatpush.msrb.mxu0 %v1296_v19  ;;  %798 = vmatpush.msrb.mxu2 %v1368_v2 }
 0x5e1   :  { %v431_v37 = vpop.f32.mrf.mxu0 }
 0x5e2   :  { %v434_v40 = vadd.f32 %v431_v37, %v1329_v38 }
 0x5e4   :  { %v950_v41 = vmul.f32 -1.442695, %v434_v40 }
 0x5e6   :  { %993 = vpow2.f32 %v950_v41 }
 0x5ec   :  { %v994_v7 = vpop.eup %993 }
 0x5ed   :  { %v439_v42 = vadd.f32 1.0, %v994_v7 }
 0x5ef   :  { %995 = vrcp.f32 %v439_v42  ;;  %v451_v45 = vand.u32 2147483648, %v439_v42  ;;  %v449_v46 = vand.u32 2147483647, %v439_v42  ;;  %vm445_vm0 = vweird.f32 %v439_v42 }
 0x5f0   :  { %997 = vtanh.f32 %v434_v40 }
 0x5f1   :  { %v452_v19 = vor.u32 1.1754944e-38, %v451_v45  ;;  %vm450_vm2 = vcmp.eq.f32.partialorder %v449_v46, 8.507059e+37 }
 0x5f5   :  { %v996_v43 = vpop.eup %995 }
 0x5f6   :  { %v441_v9 = vmul.f32 %v996_v43, %v439_v42  ;;  %vm446_vm15 = vweird.f32 %v996_v43  ;;  %v998_v38 = vpop.eup %997 }
 0x5f7   :  { %vm447_vm1 = vmor %vm445_vm0, %vm446_vm15 }
 0x5f8   :  { %v442_v44 = vsub.f32 1.0, %v441_v9 }
 0x5fa   :  { %v443_v12 = vmul.f32 %v996_v43, %v442_v44 }
 0x5fc   :  { %v444_v47 = vadd.f32 %v996_v43, %v443_v12 }
 0x5fe   :  { %v448_v48 = vsel %vm447_vm1, %v996_v43, %v444_v47 }
 0x5ff   :  { %v453_v49 = vsel %vm450_vm2, %v452_v19, %v448_v48 }
 0x600   :  { %v455_v51 = vsel %vm1334_vm7, %v998_v38, %v453_v49 }
 0x601   :  { %458 = vrot.lane.b32.xlu2 %v455_v51, %s1169_s3  ;;  %v456_v54 = vmul.f32 %v455_v51, %v364_v31 }
 0x65b   :  { %v459_v52 = vpop.permute.xlu2 %458 }
 0x65c   :  { %v461_v53 = vmul.f32 %v459_v52, %v455_v51 }
 0x65e   :  { %463 = vrot.lane.b32.xlu0 %v461_v53, %s1170_s7  ;;  %v716_v53 = vrot.slane %v1433_v26, 2 }
 0x6d0   :  { %v464_v55 = vpop.permute.xlu0 %463 }
 0x6d1   :  { %v466_v56 = vadd.f32 %v464_v55, %v456_v54  ;;  %v718_v54 = vadd.f32 %v716_v53, %v1322_v34 }
 0x6d3   :  { %999 = vtanh.f32 %v466_v56 }
 0x6d9   :  { %v1000_v57 = vpop.eup %999 }
 0x6da   :  { %469 = vrot.lane.b32.xlu1 %v1000_v57, %s1169_s3 }
 0x74c   :  { %v470_v58 = vpop.permute.xlu1 %469 }
 0x74d   :  { %v472_v59 = vmul.f32 %v470_v58, %v455_v51 }
 0x74f   :  { %474 = vrot.lane.b32.xlu2 %v472_v59, %s1170_s7 }
 0x7a9   :  { %v475_v60 = vpop.permute.xlu2 %474 }
 0x7aa   :  { %951 = vmatmul.msk.f32.vlgmr.msra.gmra.mxu1 %vm126_vm3, %v475_v60  ;;  %952 = vmatmul.msk.f32.vlgmr.msra.gmra.mxu3 %vm126_vm3, %v475_v60 }
 0x7ab   :  { %897 = vmatpush.msra.mxu1 %v1349_v63 }
 0x7ad   :  { %898 = vmatpush.msra.mxu1 %v1354_v0 }
 0x7af   :  { %899 = vmatpush.msra.mxu1 %v1361_v1 }
 0x7b1   :  { %900 = vmatpush.msra.mxu1 %v1368_v2 }
 0x82d   :  { %v533_v61 = vpop.f32.mrf.mxu3 }
 0x82e   :  { %v536_v62 = vadd.f32 %v533_v61, %v1332_v39 }
 0x830   :  { %v953_v3 = vmul.f32 -1.442695, %v536_v62 }
 0x832   :  { %1001 = vpow2.f32 %v953_v3 }
 0x838   :  { %v1002_v4 = vpop.eup %1001 }
 0x839   :  { %v541_v5 = vadd.f32 1.0, %v1002_v4 }
 0x83b   :  { %1003 = vrcp.f32 %v541_v5  ;;  %v553_v11 = vand.u32 2147483648, %v541_v5  ;;  %v551_v0 = vand.u32 2147483647, %v541_v5  ;;  %vm547_vm5 = vweird.f32 %v541_v5 }
 0x83c   :  { %1005 = vtanh.f32 %v536_v62 }
 0x83d   :  { %v554_v1 = vor.u32 1.1754944e-38, %v553_v11  ;;  %vm552_vm8 = vcmp.eq.f32.partialorder %v551_v0, 8.507059e+37 }
 0x841   :  { %v1004_v6 = vpop.eup %1003 }
 0x842   :  { %v543_v8 = vmul.f32 %v1004_v6, %v541_v5  ;;  %vm548_vm4 = vweird.f32 %v1004_v6  ;;  %v1006_v39 = vpop.eup %1005 }
 0x843   :  { %vm549_vm6 = vmor %vm547_vm5, %vm548_vm4 }
 0x844   :  { %v544_v10 = vsub.f32 1.0, %v543_v8 }
 0x846   :  { %v545_v63 = vmul.f32 %v1004_v6, %v544_v10 }
 0x848   :  { %v546_v13 = vadd.f32 %v1004_v6, %v545_v63 }
 0x84a   :  { %v550_v2 = vsel %vm549_vm6, %v1004_v6, %v546_v13  ;;  %vm292_vm6 = vcmask 1041408  }
 0x84b   :  { %v555_v14 = vsel %vm552_vm8, %v554_v1, %v550_v2 }
 0x84c   :  { %v557_v15 = vsel %vm1334_vm7, %v1006_v39, %v555_v14 }
 0x84d   :  { %560 = vrot.lane.b32.xlu0 %v557_v15, %s1169_s3  ;;  %v558_v18 = vmul.f32 %v557_v15, %v466_v56 }
 0x8bf   :  { %v561_v16 = vpop.permute.xlu0 %560 }
 0x8c0   :  { %v563_v17 = vmul.f32 %v561_v16, %v557_v15 }
 0x8c2   :  { %565 = vrot.lane.b32.xlu1 %v563_v17, %s1170_s7 }
 0x934   :  { %v566_v20 = vpop.permute.xlu1 %565 }
 0x935   :  { %v568_v21 = vadd.f32 %v566_v20, %v558_v18  ;;  %v818_v20 = vrot.slane %v1433_v26, 4 }
 0x937   :  { %1007 = vtanh.f32 %v568_v21 }
 0x93d   :  { %v1008_v22 = vpop.eup %1007 }
 0x93e   :  { %571 = vrot.lane.b32.xlu2 %v1008_v22, %s1169_s3 }
 0x998   :  { %v572_v23 = vpop.permute.xlu2 %571 }
 0x999   :  { %v574_v24 = vmul.f32 %v572_v23, %v557_v15 }
 0x99b   :  { %576 = vrot.lane.b32.xlu0 %v574_v24, %s1170_s7 }
 0xa0d   :  { %v577_v25 = vpop.permute.xlu0 %576 }
 0xa0e   :  { %954 = vmatmul.msk.f32.vlgmr.msra.gmra.mxu2 %vm126_vm3, %v577_v25  ;;  %955 = vmatmul.msk.f32.vlgmr.msra.gmra.mxu0 %vm126_vm3, %v577_v25 }
 0xa8b   :  { %v633_v28 = vpop.f32.mrf.mxu0 }
 0xa8c   :  { %v636_v29 = vadd.f32 %v633_v28, %v615_v27 }
 0xa8e   :  { %v956_v30 = vmul.f32 -1.442695, %v636_v29 }
 0xa90   :  { %1009 = vpow2.f32 %v956_v30 }
 0xa96   :  { %v1010_v31 = vpop.eup %1009 }
 0xa97   :  { %v641_v32 = vadd.f32 1.0, %v1010_v31 }
 0xa99   :  { %1011 = vrcp.f32 %v641_v32  ;;  %v653_v37 = vand.u32 2147483648, %v641_v32  ;;  %v651_v41 = vand.u32 2147483647, %v641_v32  ;;  %vm647_vm10 = vweird.f32 %v641_v32 }
 0xa9a   :  { %1013 = vtanh.f32 %v636_v29 }
 0xa9b   :  { %v654_v42 = vor.u32 1.1754944e-38, %v653_v37  ;;  %vm652_vm12 = vcmp.eq.f32.partialorder %v651_v41, 8.507059e+37 }
 0xa9f   :  { %v1012_v33 = vpop.eup %1011 }
 0xaa0   :  { %v643_v35 = vmul.f32 %v1012_v33, %v641_v32  ;;  %vm648_vm9 = vweird.f32 %v1012_v33  ;;  %v1014_v9 = vpop.eup %1013 }
 0xaa1   :  { %vm649_vm11 = vmor %vm647_vm10, %vm648_vm9 }
 0xaa2   :  { %v644_v36 = vsub.f32 1.0, %v643_v35 }
 0xaa4   :  { %v645_v40 = vmul.f32 %v1012_v33, %v644_v36 }
 0xaa6   :  { %v646_v7 = vadd.f32 %v1012_v33, %v645_v40 }
 0xaa8   :  { %v650_v43 = vsel %vm649_vm11, %v1012_v33, %v646_v7 }
 0xaa9   :  { %v655_v44 = vsel %vm652_vm12, %v654_v42, %v650_v43  ;;  %v1464_v42 = vld [vmem:[%s1529_s9] ss:$0 sm:$0xff]  ;;  %v289_v43 = vpop.f32.mrf.mxu1  ;;  %s1171_s9 = smov [#allocation8]  }
 0xaaa   :  { %v657_v45 = vsel %vm1334_vm7, %v1014_v9, %v655_v44  ;;  %v290_v9 = vadd.f32 %v1464_v42, %v289_v43  ;;  %s924_s26 = sshll.u32 %s1171_s9, 4  ;;  %s925_s26 = int_to_ptr.vmem [resolvable:$true] %s924_s26 }
 0xaab   :  { %660 = vrot.lane.b32.xlu1 %v657_v45, %s1169_s3  ;;  %v658_v47 = vmul.f32 %v657_v45, %v568_v21  ;;  %v820_v21 = vadd.f32 %v818_v20, %v1322_v34 }
 0xaac   :  { %v293_v44 = vsel %vm292_vm6, %v290_v9, -inf }
 0xb1d   :  { %v661_v12 = vpop.permute.xlu1 %660 }
 0xb1e   :  { %v663_v46 = vmul.f32 %v661_v12, %v657_v45 }
 0xb20   :  { %665 = vrot.lane.b32.xlu2 %v663_v46, %s1170_s7 }
 0xb7a   :  { %v666_v19 = vpop.permute.xlu2 %665 }
 0xb7b   :  { %v668_v48 = vadd.f32 %v666_v19, %v658_v47 }
 0xb7d   :  { %1015 = vtanh.f32 %v668_v48 }
 0xb83   :  { %v1016_v38 = vpop.eup %1015 }
 0xb84   :  { %671 = vrot.lane.b32.xlu0 %v1016_v38, %s1169_s3 }
 0xbf6   :  { %v672_v49 = vpop.permute.xlu0 %671 }
 0xbf7   :  { %v674_v51 = vmul.f32 %v672_v49, %v657_v45  ;;  %v495_v45 = vpop.f32.mrf.mxu1 }
 0xbf8   :  { %v1469_v50 = vadd.f32 %v1464_v42, %v495_v45 }
 0xbf9   :  { %676 = vrot.lane.b32.xlu1 %v674_v51, %s1170_s7 }
 0xbfa   :  { %v498_v12 = vsel %vm292_vm6, %v1469_v50, -inf }
 0xc6b   :  { %v677_v52 = vpop.permute.xlu1 %676 }
 0xc6c   :  { %957 = vmatmul.msk.f32.vlgmr.msrb.gmra.mxu1 %vm126_vm3, %v677_v52  ;;  %958 = vmatmul.msk.f32.vlgmr.msrb.gmra.mxu3 %vm126_vm3, %v677_v52 }
 0xcef   :  { %v736_v55 = vpop.f32.mrf.mxu3 }
 0xcf0   :  { %v739_v56 = vadd.f32 %v736_v55, %v718_v54 }
 0xcf2   :  { %v959_v57 = vmul.f32 -1.442695, %v739_v56 }
 0xcf4   :  { %1017 = vpow2.f32 %v959_v57 }
 0xcfa   :  { %v1018_v58 = vpop.eup %1017 }
 0xcfb   :  { %v744_v59 = vadd.f32 1.0, %v1018_v58 }
 0xcfd   :  { %1019 = vrcp.f32 %v744_v59  ;;  %v756_v3 = vand.u32 2147483648, %v744_v59  ;;  %v754_v5 = vand.u32 2147483647, %v744_v59  ;;  %vm750_vm14 = vweird.f32 %v744_v59 }
 0xcfe   :  { %1021 = vtanh.f32 %v739_v56  ;;  %v393_v56 = vpop.f32.mrf.mxu2 }
 0xcff   :  { %v757_v8 = vor.u32 1.1754944e-38, %v756_v3  ;;  %vm755_vm0 = vcmp.eq.f32.partialorder %v754_v5, 8.507059e+37  ;;  %v1477_v57 = vadd.f32 %v1464_v42, %v393_v56 }
 0xd01   :  { %v396_v58 = vsel %vm292_vm6, %v1477_v57, -inf }
 0xd03   :  { %v1020_v60 = vpop.eup %1019 }
 0xd04   :  { %v746_v61 = vmul.f32 %v1020_v60, %v744_v59  ;;  %vm751_vm13 = vweird.f32 %v1020_v60  ;;  %v1022_v11 = vpop.eup %1021 }
 0xd05   :  { %vm752_vm15 = vmor %vm750_vm14, %vm751_vm13 }
 0xd06   :  { %v747_v62 = vsub.f32 1.0, %v746_v61  ;;  %v597_v59 = vpop.f32.mrf.mxu2 }
 0xd08   :  { %v748_v4 = vmul.f32 %v1020_v60, %v747_v62 }
 0xd0a   :  { %v749_v6 = vadd.f32 %v1020_v60, %v748_v4 }
 0xd0c   :  { %v753_v10 = vsel %vm752_vm15, %v1020_v60, %v749_v6  ;;  %v1482_v60 = vadd.f32 %v1464_v42, %v597_v59 }
 0xd0d   :  { %v758_v63 = vsel %vm755_vm0, %v757_v8, %v753_v10 }
 0xd0e   :  { %v760_v0 = vsel %vm1334_vm7, %v1022_v11, %v758_v63  ;;  %v600_v61 = vsel %vm292_vm6, %v1482_v60, -inf }
 0xd0f   :  { %763 = vrot.lane.b32.xlu2 %v760_v0, %s1169_s3  ;;  %v761_v2 = vmul.f32 %v760_v0, %v668_v48 }
 0xd69   :  { %v764_v13 = vpop.permute.xlu2 %763 }
 0xd6a   :  { %v766_v1 = vmul.f32 %v764_v13, %v760_v0 }
 0xd6c   :  { %768 = vrot.lane.b32.xlu0 %v766_v1, %s1170_s7 }
 0xdde   :  { %v769_v39 = vpop.permute.xlu0 %768 }
 0xddf   :  { %v771_v14 = vadd.f32 %v769_v39, %v761_v2 }
 0xde1   :  { %1023 = vtanh.f32 %v771_v14 }
 0xde7   :  { %v1024_v15 = vpop.eup %1023 }
 0xde8   :  { %774 = vrot.lane.b32.xlu1 %v1024_v15, %s1169_s3 }
 0xe5a   :  { %v775_v16 = vpop.permute.xlu1 %774 }
 0xe5b   :  { %v777_v17 = vmul.f32 %v775_v16, %v760_v0 }
 0xe5d   :  { %779 = vrot.lane.b32.xlu2 %v777_v17, %s1170_s7 }
 0xeb7   :  { %v780_v18 = vpop.permute.xlu2 %779 }
 0xeb8   :  { %960 = vmatmul.msk.f32.vlgmr.msrb.gmra.mxu2 %vm126_vm3, %v780_v18  ;;  %961 = vmatmul.msk.f32.vlgmr.msrb.gmra.mxu0 %vm126_vm3, %v780_v18 }
 0xf35   :  { %v838_v22 = vpop.f32.mrf.mxu0 }
 0xf36   :  { %v841_v23 = vadd.f32 %v838_v22, %v820_v21 }
 0xf38   :  { %v962_v24 = vmul.f32 -1.442695, %v841_v23 }
 0xf3a   :  { %1025 = vpow2.f32 %v962_v24 }
 0xf3b   :  { %v800_v62 = vpop.f32.mrf.mxu2 }
 0xf3c   :  { %v1487_v3 = vadd.f32 %v1464_v42, %v800_v62 }
 0xf3e   :  { %v803_v4 = vsel %vm292_vm6, %v1487_v3, -inf }
 0xf40   :  { %v1026_v25 = vpop.eup %1025 }
 0xf41   :  { %v846_v27 = vadd.f32 1.0, %v1026_v25 }
 0xf43   :  { %1027 = vrcp.f32 %v846_v27  ;;  %v858_v31 = vand.u32 2147483648, %v846_v27  ;;  %v856_v33 = vand.u32 2147483647, %v846_v27  ;;  %vm852_vm2 = vweird.f32 %v846_v27 }
 0xf44   :  { %1029 = vtanh.f32 %v841_v23 }
 0xf45   :  { %v859_v26 = vor.u32 1.1754944e-38, %v858_v31  ;;  %vm857_vm5 = vcmp.eq.f32.partialorder %v856_v33, 8.507059e+37 }
 0xf49   :  { %v1028_v28 = vpop.eup %1027 }
 0xf4a   :  { %v848_v29 = vmul.f32 %v1028_v28, %v846_v27  ;;  %vm853_vm1 = vweird.f32 %v1028_v28  ;;  %v1030_v36 = vpop.eup %1029 }
 0xf4b   :  { %vm854_vm4 = vmor %vm852_vm2, %vm853_vm1 }
 0xf4c   :  { %v849_v30 = vsub.f32 1.0, %v848_v29  ;;  %v697_v29 = vpop.f32.mrf.mxu1 }
 0xf4e   :  { %v850_v32 = vmul.f32 %v1028_v28, %v849_v30  ;;  %v698_v30 = vadd.f32 %v1464_v42, %v697_v29 }
 0xf50   :  { %v851_v35 = vadd.f32 %v1028_v28, %v850_v32  ;;  %v700_v33 = vsel %vm292_vm6, %v698_v30, -inf }
 0xf52   :  { %v855_v34 = vsel %vm854_vm4, %v1028_v28, %v851_v35 }
 0xf53   :  { %v860_v37 = vsel %vm857_vm5, %v859_v26, %v855_v34 }
 0xf54   :  { %v862_v40 = vsel %vm1334_vm7, %v1030_v36, %v860_v37 }
 0xf55   :  { %865 = vrot.lane.b32.xlu0 %v862_v40, %s1169_s3  ;;  %v863_v46 = vmul.f32 %v862_v40, %v771_v14 }
 0xfc7   :  { %v866_v41 = vpop.permute.xlu0 %865 }
 0xfc8   :  { %v868_v7 = vmul.f32 %v866_v41, %v862_v40 }
 0xfca   :  { %870 = vrot.lane.b32.xlu1 %v868_v7, %s1170_s7 }
 0xff4   :  { %294 = vmax.xlane.f32.xlu1 %v293_v44 }
 0xffc   :  { %499 = vmax.xlane.f32.xlu1 %v498_v12 }
0x103c   :  { %v871_v47 = vpop.permute.xlu1 %870 }
0x103d   :  { %v873_v19 = vadd.f32 %v871_v47, %v863_v46 }
0x103f   :  { %1031 = vtanh.f32 %v873_v19 }
0x1045   :  { %v1032_v48 = vpop.eup %1031 }
0x1046   :  { %876 = vrot.lane.b32.xlu2 %v1032_v48, %s1169_s3 }
0x1067   :  { %v295_v38 = vpop.xlane.xlu1 %294 }
0x1068   :  { %v296_v49 = vsub.f32 %v290_v9, %v295_v38 }
0x106a   :  { %v297_v51 = vmul.f32 1.442695, %v296_v49 }
0x106c   :  { %1033 = vpow2.f32 %v297_v51 }
0x106f   :  { %v500_v0 = vpop.xlane.xlu1 %499 }
0x1070   :  { %v501_v2 = vsub.f32 %v1469_v50, %v500_v0 }
0x1072   :  { %v1034_v52 = vpop.eup %1033  ;;  %v502_v14 = vmul.f32 1.442695, %v501_v2 }
0x1073   :  { %v299_v53 = vsel %vm292_vm6, %v1034_v52, 0.0 }
0x1074   :  { %300 = vadd.xlane.f32.xlu2 %v299_v53 }
0x10a0   :  { %v877_v54 = vpop.permute.xlu2 %876 }
0x10a1   :  { %v879_v55 = vmul.f32 %v877_v54, %v862_v40 }
0x10a3   :  { %881 = vrot.lane.b32.xlu0 %v879_v55, %s1170_s7 }
0x10cd   :  { %397 = vmax.xlane.f32.xlu0 %v396_v58 }
0x10d5   :  { %601 = vmax.xlane.f32.xlu0 %v600_v61 }
0x10dd   :  { %804 = vmax.xlane.f32.xlu0 %v803_v4 }
0x10e7   :  { %v301_v5 = vpop.xlane.xlu2 %300 }
0x10e8   :  { %1035 = vlog2.f32 %v301_v5 }
0x10ee   :  { %v1036_v6 = vpop.eup %1035 }
0x10ef   :  { %v303_v8 = vmul.f32 0.6931472, %v1036_v6 }
0x10f1   :  { %v304_v10 = vadd.f32 %v303_v8, %v295_v38 }
0x10f3   :  { %v305_v11 = vsub.f32 %v290_v9, %v304_v10 }
0x10f5   :  { %307 = vst [vmem:[#allocation8 + $0x2] sm:$0x3] %v305_v11 }
0x1115   :  { %v882_v63 = vpop.permute.xlu0 %881 }
0x1116   :  { %963 = vmatmul.msk.f32.vlgmr.msra.gmra.mxu1 %vm126_vm3, %v882_v63 }
0x1140   :  { %v398_v13 = vpop.xlane.xlu0 %397 }
0x1141   :  { %v399_v1 = vsub.f32 %v1477_v57, %v398_v13 }
0x1143   :  { %v400_v39 = vmul.f32 1.442695, %v399_v1 }
0x1145   :  { %1037 = vpow2.f32 %v400_v39 }
0x1146   :  { %1039 = vpow2.f32 %v502_v14 }
0x1148   :  { %v602_v15 = vpop.xlane.xlu0 %601 }
0x1149   :  { %v603_v16 = vsub.f32 %v1482_v60, %v602_v15 }
0x114b   :  { %v1038_v17 = vpop.eup %1037  ;;  %v604_v18 = vmul.f32 1.442695, %v603_v16 }
0x114c   :  { %v402_v20 = vsel %vm292_vm6, %v1038_v17, 0.0  ;;  %v1040_v22 = vpop.eup %1039 }
0x114d   :  { %1041 = vpow2.f32 %v604_v18  ;;  %403 = vadd.xlane.f32.xlu2 %v402_v20  ;;  %v504_v28 = vsel %vm292_vm6, %v1040_v22, 0.0 }
0x1150   :  { %v805_v21 = vpop.xlane.xlu0 %804 }
0x1151   :  { %v806_v23 = vsub.f32 %v1487_v3, %v805_v21 }
0x1153   :  { %v1042_v24 = vpop.eup %1041  ;;  %v807_v25 = vmul.f32 1.442695, %v806_v23 }
0x1154   :  { %v606_v27 = vsel %vm292_vm6, %v1042_v24, 0.0 }
0x1155   :  { %1043 = vpow2.f32 %v807_v25  ;;  %607 = vadd.xlane.f32.xlu1 %v606_v27  ;;  %505 = vadd.xlane.f32.xlu2 %v504_v28 }
0x115b   :  { %v1044_v31 = vpop.eup %1043 }
0x115c   :  { %v809_v32 = vsel %vm292_vm6, %v1044_v31, 0.0 }
0x115d   :  { %810 = vadd.xlane.f32.xlu0 %v809_v32  ;;  %701 = vmax.xlane.f32.xlu2 %v700_v33 }
0x1193   :  { %v902_v35 = vpop.f32.mrf.mxu1 }
0x1194   :  { %v1503_v26 = vadd.f32 %v1464_v42, %v902_v35 }
0x1196   :  { %v905_v34 = vsel %vm292_vm6, %v1503_v26, -inf }
0x1197   :  { %906 = vmax.xlane.f32.xlu1 %v905_v34 }
0x11c0   :  { %v404_v36 = vpop.xlane.xlu2 %403 }
0x11c1   :  { %1045 = vlog2.f32 %v404_v36 }
0x11c7   :  { %v1046_v37 = vpop.eup %1045 }
0x11c8   :  { %v406_v40 = vmul.f32 0.6931472, %v1046_v37  ;;  %v506_v41 = vpop.xlane.xlu2 %505  ;;  %v608_v7 = vpop.xlane.xlu1 %607 }
0x11c9   :  { %1047 = vlog2.f32 %v506_v41 }
0x11ca   :  { %v407_v43 = vadd.f32 %v406_v40, %v398_v13  ;;  %1049 = vlog2.f32 %v608_v7 }
0x11cc   :  { %v408_v9 = vsub.f32 %v1477_v57, %v407_v43 }
0x11ce   :  { %410 = vst [vmem:[#allocation8 + $0x4] sm:$0x3] %v408_v9 }
0x11cf   :  { %v1048_v44 = vpop.eup %1047 }
0x11d0   :  { %v1050_v45 = vpop.eup %1049  ;;  %v508_v42 = vmul.f32 0.6931472, %v1048_v44  ;;  %v811_v12 = vpop.xlane.xlu0 %810 }
0x11d1   :  { %v702_v46 = vpop.xlane.xlu2 %701  ;;  %v610_v47 = vmul.f32 0.6931472, %v1050_v45  ;;  %1051 = vlog2.f32 %v811_v12 }
0x11d2   :  { %v703_v19 = vsub.f32 %v698_v30, %v702_v46  ;;  %v509_v48 = vadd.f32 %v508_v42, %v500_v0 }
0x11d3   :  { %v611_v38 = vadd.f32 %v610_v47, %v602_v15 }
0x11d4   :  { %v704_v49 = vmul.f32 1.442695, %v703_v19  ;;  %v510_v51 = vsub.f32 %v1469_v50, %v509_v48 }
0x11d5   :  { %v612_v52 = vsub.f32 %v1482_v60, %v611_v38 }
0x11d6   :  { %1053 = vpow2.f32 %v704_v49  ;;  %512 = vst [vmem:[#allocation8 + $0x6] sm:$0x3] %v510_v51 }
0x11d7   :  { %v1052_v53 = vpop.eup %1051  ;;  %614 = vst [vmem:[#allocation8 + $0x8] sm:$0x3] %v612_v52 }
0x11d8   :  { %v813_v54 = vmul.f32 0.6931472, %v1052_v53 }
0x11da   :  { %v814_v55 = vadd.f32 %v813_v54, %v805_v21 }
0x11dc   :  { %v1054_v56 = vpop.eup %1053  ;;  %v815_v57 = vsub.f32 %v1487_v3, %v814_v55 }
0x11dd   :  { %v706_v58 = vsel %vm292_vm6, %v1054_v56, 0.0 }
0x11de   :  { %707 = vadd.xlane.f32.xlu2 %v706_v58  ;;  %817 = vst [vmem:[#allocation8 + $0xc] sm:$0x3] %v815_v57 }
0x120a   :  { %v907_v59 = vpop.xlane.xlu1 %906 }
0x120b   :  { %v908_v61 = vsub.f32 %v1503_v26, %v907_v59 }
0x120d   :  { %v909_v62 = vmul.f32 1.442695, %v908_v61 }
0x120f   :  { %1055 = vpow2.f32 %v909_v62 }
0x1215   :  { %v1056_v50 = vpop.eup %1055 }
0x1216   :  { %v911_v60 = vsel %vm292_vm6, %v1056_v50, 0.0 }
0x1217   :  { %912 = vadd.xlane.f32.xlu1 %v911_v60 }
0x1251   :  { %v708_v4 = vpop.xlane.xlu2 %707 }
0x1252   :  { %1057 = vlog2.f32 %v708_v4 }
0x1258   :  { %v1058_v5 = vpop.eup %1057 }
0x1259   :  { %v710_v6 = vmul.f32 0.6931472, %v1058_v5 }
0x125b   :  { %v711_v8 = vadd.f32 %v710_v6, %v702_v46 }
0x125d   :  { %v712_v10 = vsub.f32 %v698_v30, %v711_v8 }
0x125f   :  { %714 = vst [vmem:[#allocation8 + $0xa] sm:$0x3] %v712_v10 }
0x128a   :  { %v913_v3 = vpop.xlane.xlu1 %912 }
0x128b   :  { %1059 = vlog2.f32 %v913_v3 }
0x1291   :  { %v1060_v11 = vpop.eup %1059 }
0x1292   :  { %v915_v63 = vmul.f32 0.6931472, %v1060_v11 }
0x1294   :  { %v916_v0 = vadd.f32 %v915_v63, %v907_v59 }
0x1296   :  { %v917_v13 = vsub.f32 %v1503_v26, %v916_v0 }
0x1298   :  { %919 = vst [vmem:[#allocation8 + $0xe] sm:$0x3] %v917_v13 }
0x1299   :  { %932 = dma.vmem_to_hbm [thread:$0]  %s925_s26, 256, %s927_s28, [#allocation4], %s1170_s7, %s1170_s7, %s1172_s0  }
0x129a   :  { %1161 = dma.done.wait [#allocation4], 256  }
0x129b   :  { %1162 = vsyncadd [#allocation4], 4294967040 }
0x129c   :  { %937 = vsyncpa [#allocation3], 1 }
0x129d   :  { %938 = vsyncpa [#allocation6], 1 }
0x129e   :  { %939 = vsyncpa [#allocation4], 1 }

</bundles_post_ra>
